<compile_context>
chip_gen: v7x
topology: tpu7x:2x2x1
jax: 0.10.0
libtpu: 0.0.40
codegen_flags: <defaults>
</compile_context>

<pallas_src>
import jax
import jax.numpy as jnp
from jax import lax
from jax.experimental import pallas as pl
from jax.experimental.pallas import tpu as pltpu

# ----------------------------- sizes (small, deterministic) -----------------
B = 2          # batch
BP = 8         # batch padded to one sublane group
L = 8          # sequence length
VOCAB = 100    # toy vocab for the BERT stand-in
D = 32         # "bert hidden_size"
O = 16         # output_dim (LSTM hidden size)
G = 4 * O      # gate width
EPS = 1e-12    # F.normalize default eps


# ------------------------------- Pallas kernel ------------------------------
def _lstm_mask_norm_kernel(x_ref,        # (L*BP, D)   f32  time-major flattened BERT features
                           mask_ref,     # (BP, L*O)   f32  lane-dense padding mask
                           segsum_ref,   # (L*O, L*O)  f32  block-diagonal segment-sum matrix
                           wih0_ref,     # (D, G)      f32  layer-0 W_ih^T, gate-prescaled
                           whh0_ref,     # (O, G)      f32  layer-0 W_hh^T, gate-prescaled
                           b0_ref,       # (1, G)      f32  folded+prescaled layer-0 bias
                           wih1_ref,     # (O, G)      f32  layer-1 W_ih^T, gate-prescaled
                           whh1_ref,     # (O, G)      f32  layer-1 W_hh^T, gate-prescaled
                           b1_ref,       # (BP, G)     f32  folded+prescaled layer-1 bias (pre-broadcast)
                           out_ref,      # (BP, L*O)   f32  lane-dense output slab
                           xw0_ref,      # scratch (L*BP, G) f32: hoisted layer-0 input proj
                           h1_ref):      # scratch (BP, L*O) f32: lane-dense layer-1 hiddens
    # ---- hoisted layer-0 input projection (one big matmul, bias folded in) ----
    xw0_ref[...] = (jnp.dot(x_ref[...], wih0_ref[...],
                            preferred_element_type=jnp.float32) + b0_ref[...])

    whh0 = whh0_ref[...]
    wih1 = wih1_ref[...]
    whh1 = whh1_ref[...]
    b1 = b1_ref[...]

    def cell(pre_gates, c):
        # Gates are pre-scaled (i/f/o columns by 0.5), so a single tanh over the full
        # (BP, 4O) tile gives sigmoid via 0.5*tanh(x/2)+0.5 for i/f/o and tanh for g.
        th = jnp.tanh(pre_gates)
        i = 0.5 * th[:, 0 * O:1 * O] + 0.5
        f = 0.5 * th[:, 1 * O:2 * O] + 0.5
        g = th[:, 2 * O:3 * O]
        o = 0.5 * th[:, 3 * O:4 * O] + 0.5
        c_new = f * c + i * g
        h_new = o * jnp.tanh(c_new)
        return h_new, c_new

    zeros = jnp.zeros((BP, O), jnp.float32)
    h0, c0 = zeros, zeros
    h1, c1 = zeros, zeros

    # ---- wavefront-fused recurrence ------------------------------------------
    # Iteration t: layer-1 cell for step t-1 (uses h0_{t-1}, still bound to `h0`)
    # and layer-0 cell for step t.  The two cells are independent, so the VLIW
    # scheduler overlaps their MXU/EUP latency; dependent chain ~ L+1 cells.
    for t in range(L + 1):
        if t >= 1:
            pre1 = (jnp.dot(h0, wih1, preferred_element_type=jnp.float32) + b1
                    + jnp.dot(h1, whh1, preferred_element_type=jnp.float32))
            h1, c1 = cell(pre1, c1)
            h1_ref[:, (t - 1) * O:t * O] = h1          # lane-dense accumulation
        if t < L:
            pre0 = xw0_ref[t * BP:(t + 1) * BP, :]
            pre0 = pre0 + jnp.dot(h0, whh0, preferred_element_type=jnp.float32)
            h0, c0 = cell(pre0, c0)

    # ---- epilogue: mask + per-token L2 normalize, single lane-dense store ----
    q = h1_ref[...] * mask_ref[...]                          # (BP, L*O)
    sumsq = jnp.dot(q * q, segsum_ref[...],
                    preferred_element_type=jnp.float32)      # per-16-lane-segment sumsq
    out_ref[...] = q * lax.rsqrt(jnp.maximum(sumsq, EPS * EPS))


def question_embedding_pallas(input_ids, bert_out, kernel_params):
    """input_ids: (B, L) int32, bert_out: (B, L, D) f32 -> (B, L, O) f32."""
    (wih0, whh0, b0, wih1, whh1, b1) = kernel_params

    # time-major, batch padded to BP (one sublane group), flattened to 2D
    xp = jnp.pad(bert_out.astype(jnp.float32), ((0, BP - B), (0, 0), (0, 0)))   # (BP, L, D)
    x_flat = jnp.transpose(xp, (1, 0, 2)).reshape(L * BP, D)                    # (L*BP, D)

    # lane-dense float mask slab matching the (BP, L*O) output layout
    mask_f = (input_ids != 0).astype(jnp.float32)                               # (B, L)
    mask_slab = jnp.repeat(jnp.pad(mask_f, ((0, BP - B), (0, 0))), O, axis=1)   # (BP, L*O)

    # block-diagonal segment-sum matrix: broadcasts each token's sumsq to its O lanes
    seg = jnp.arange(L * O) // O
    segsum = (seg[:, None] == seg[None, :]).astype(jnp.float32)                 # (L*O, L*O)

    vmem = pl.BlockSpec(memory_space=pltpu.MemorySpace.VMEM)
    out = pl.pallas_call(
        _lstm_mask_norm_kernel,
        out_shape=jax.ShapeDtypeStruct((BP, L * O), jnp.float32),
        in_specs=[vmem] * 9,
        out_specs=vmem,
        scratch_shapes=[
            pltpu.VMEM((L * BP, G), jnp.float32),    # xw0: hoisted layer-0 input proj
            pltpu.VMEM((BP, L * O), jnp.float32),    # h1:  lane-dense layer-1 hiddens
        ],
    )(x_flat, mask_slab, segsum, wih0, whh0, b0, wih1, whh1, b1)

    # (BP, L*O) -> (B, L, O); layout is already batch-first, just drop padding
    return out.reshape(BP, L, O)[:B]


# --------------------------- parameter construction -------------------------
def init_lstm_params(key):
    """PyTorch-style uniform(-1/sqrt(O), 1/sqrt(O)) init; kernel weights pre-transposed
    and gate-prescaled (i/f/o columns * 0.5) for the single-tanh gate evaluation."""
    k = 1.0 / jnp.sqrt(jnp.float32(O))
    keys = jax.random.split(key, 8)

    def u(kk, shape):
        return jax.random.uniform(kk, shape, jnp.float32, -k, k)

    # layer 0: W_ih (4O, D), W_hh (4O, O), biases (4O,)
    w_ih0 = u(keys[0], (G, D))
    w_hh0 = u(keys[1], (G, O))
    b_ih0 = u(keys[2], (G,))
    b_hh0 = u(keys[3], (G,))
    # layer 1: W_ih (4O, O), W_hh (4O, O), biases (4O,)
    w_ih1 = u(keys[4], (G, O))
    w_hh1 = u(keys[5], (G, O))
    b_ih1 = u(keys[6], (G,))
    b_hh1 = u(keys[7], (G,))

    # pre-scale i/f/o gate columns by 0.5 (g keeps 1.0): sigmoid(x) = 0.5*tanh(x/2)+0.5
    gate_scale = jnp.concatenate([jnp.full((O,), 0.5, jnp.float32),
                                  jnp.full((O,), 0.5, jnp.float32),
                                  jnp.ones((O,), jnp.float32),
                                  jnp.full((O,), 0.5, jnp.float32)])

    kernel_params = (
        w_ih0.T * gate_scale[None, :],                                   # (D, G)
        w_hh0.T * gate_scale[None, :],                                   # (O, G)
        ((b_ih0 + b_hh0) * gate_scale)[None, :],                         # (1, G)
        w_ih1.T * gate_scale[None, :],                                   # (O, G)
        w_hh1.T * gate_scale[None, :],                                   # (O, G)
        jnp.tile(((b_ih1 + b_hh1) * gate_scale)[None, :], (BP, 1)),      # (BP, G)
    )
    raw_params = (w_ih0, w_hh0, b_ih0, b_hh0, w_ih1, w_hh1, b_ih1, b_hh1)
    return kernel_params, raw_params


def bert_stand_in(input_ids, attention_mask, emb_table):
    # TODO(synk): a full pretrained bert-base-uncased encoder cannot be reproduced
    # in-script; this deterministic embedding lookup stands in for BertModel(...)[0].
    q = emb_table[input_ids]                                   # (B, L, D)
    return q * attention_mask[..., None].astype(jnp.float32)


# ------------------------------ pure-JAX reference ---------------------------
def reference(input_ids, bert_out, raw_params):
    (w_ih0, w_hh0, b_ih0, b_hh0, w_ih1, w_hh1, b_ih1, b_hh1) = raw_params

    def run_layer(x, w_ih, w_hh, b_ih, b_hh):
        def cell(carry, x_t):
            h, c = carry
            gates = x_t @ w_ih.T + b_ih + h @ w_hh.T + b_hh
            i, f, g, o = jnp.split(gates, 4, axis=-1)
            i, f, o = jax.nn.sigmoid(i), jax.nn.sigmoid(f), jax.nn.sigmoid(o)
            g = jnp.tanh(g)
            c = f * c + i * g
            h = o * jnp.tanh(c)
            return (h, c), h
        init = (jnp.zeros((B, O), jnp.float32), jnp.zeros((B, O), jnp.float32))
        _, hs = lax.scan(cell, init, jnp.transpose(x, (1, 0, 2)))
        return jnp.transpose(hs, (1, 0, 2))

    q = run_layer(bert_out, w_ih0, w_hh0, b_ih0, b_hh0)
    q = run_layer(q, w_ih1, w_hh1, b_ih1, b_hh1)
    mask = (input_ids != 0).astype(jnp.float32)[..., None]
    q = q * mask
    norm = jnp.linalg.norm(q, axis=2, keepdims=True)
    return q / jnp.maximum(norm, EPS)


# ------------------------------------ main -----------------------------------
if __name__ == "__main__":
    key = jax.random.PRNGKey(0)
    k_ids, k_emb, k_lstm = jax.random.split(key, 3)

    # token ids with trailing padding zeros (exercises the mask)
    input_ids = jax.random.randint(k_ids, (B, L), 1, VOCAB, dtype=jnp.int32)
    pad = jnp.arange(L)[None, :] >= jnp.array([[L - 2], [L - 3]])
    input_ids = jnp.where(pad, 0, input_ids)
    attention_mask = (input_ids != 0).astype(jnp.int32)

    emb_table = jax.random.normal(k_emb, (VOCAB, D), jnp.float32) * 0.1
    kernel_params, raw_params = init_lstm_params(k_lstm)

    bert_out = bert_stand_in(input_ids, attention_mask, emb_table)

    out = question_embedding_pallas(input_ids, bert_out, kernel_params)
    out = jax.block_until_ready(out)

    ref = reference(input_ids, bert_out, raw_params)
    assert out.shape == (B, L, O), out.shape
    assert jnp.allclose(out, ref, rtol=1e-4, atol=2e-5), float(jnp.max(jnp.abs(out - ref)))

    print("KERNEL_OK")
</pallas_src>

<mosaic_0001>
module attributes {stable_mosaic.version = 11 : i64} {
  func.func @_lstm_mask_norm_kernel(%arg0: memref<64x32xf32, #tpu.memory_space<vmem>>, %arg1: memref<8x128xf32, #tpu.memory_space<vmem>>, %arg2: memref<128x128xf32, #tpu.memory_space<vmem>>, %arg3: memref<32x64xf32, #tpu.memory_space<vmem>>, %arg4: memref<16x64xf32, #tpu.memory_space<vmem>>, %arg5: memref<1x64xf32, #tpu.memory_space<vmem>>, %arg6: memref<16x64xf32, #tpu.memory_space<vmem>>, %arg7: memref<16x64xf32, #tpu.memory_space<vmem>>, %arg8: memref<8x64xf32, #tpu.memory_space<vmem>>, %arg9: memref<8x128xf32, #tpu.memory_space<vmem>>, %arg10: memref<64x64xf32, #tpu.memory_space<vmem>>, %arg11: memref<8x128xf32, #tpu.memory_space<vmem>>) attributes {dimension_semantics = [], scalar_prefetch = 0 : i64, scratch_operands = 2 : i64, tpu.core_type = #tpu.core_type<tc>} {
    %c0 = arith.constant 0 : index
    %c0_0 = arith.constant 0 : index
    %0 = vector.load %arg0[%c0, %c0_0] : memref<64x32xf32, #tpu.memory_space<vmem>>, vector<64x32xf32>
    %c0_1 = arith.constant 0 : index
    %c0_2 = arith.constant 0 : index
    %1 = vector.load %arg3[%c0_1, %c0_2] : memref<32x64xf32, #tpu.memory_space<vmem>>, vector<32x64xf32>
    %cst = arith.constant dense<0.000000e+00> : vector<64x64xf32>
    %2 = tpu.matmul %0, %1, %cst {dimension_numbers = #tpu.dot_dimension_numbers<[1], [0], [0], [1], [0, 0, 1, 1], [], []>} : vector<64x32xf32>, vector<32x64xf32>, vector<64x64xf32> -> vector<64x64xf32>
    %c0_3 = arith.constant 0 : index
    %c0_4 = arith.constant 0 : index
    %3 = vector.load %arg5[%c0_3, %c0_4] : memref<1x64xf32, #tpu.memory_space<vmem>>, vector<1x64xf32>
    %4 = vector.broadcast %3 : vector<1x64xf32> to vector<64x64xf32>
    %5 = arith.addf %2, %4 : vector<64x64xf32>
    %c0_5 = arith.constant 0 : index
    %c0_6 = arith.constant 0 : index
    %6 = vector.load %arg10[%c0_5, %c0_6] : memref<64x64xf32, #tpu.memory_space<vmem>>, vector<64x64xf32>
    tpu.vector_store %arg10[%c0_5, %c0_6], %5 {strides = array<i32>} : memref<64x64xf32, #tpu.memory_space<vmem>>, vector<64x64xf32>,
    %c0_7 = arith.constant 0 : index
    %c0_8 = arith.constant 0 : index
    %7 = vector.load %arg4[%c0_7, %c0_8] : memref<16x64xf32, #tpu.memory_space<vmem>>, vector<16x64xf32>
    %c0_9 = arith.constant 0 : index
    %c0_10 = arith.constant 0 : index
    %8 = vector.load %arg6[%c0_9, %c0_10] : memref<16x64xf32, #tpu.memory_space<vmem>>, vector<16x64xf32>
    %c0_11 = arith.constant 0 : index
    %c0_12 = arith.constant 0 : index
    %9 = vector.load %arg7[%c0_11, %c0_12] : memref<16x64xf32, #tpu.memory_space<vmem>>, vector<16x64xf32>
    %c0_13 = arith.constant 0 : index
    %c0_14 = arith.constant 0 : index
    %10 = vector.load %arg8[%c0_13, %c0_14] : memref<8x64xf32, #tpu.memory_space<vmem>>, vector<8x64xf32>
    %cst_15 = arith.constant 0.000000e+00 : f32
    %11 = vector.broadcast %cst_15 : f32 to vector<8x16xf32>
    %c0_16 = arith.constant 0 : index
    %c0_17 = arith.constant 0 : index
    %12 = vector.load %arg10[%c0_16, %c0_17] : memref<64x64xf32, #tpu.memory_space<vmem>>, vector<8x64xf32>
    %cst_18 = arith.constant dense<0.000000e+00> : vector<8x64xf32>
    %13 = tpu.matmul %11, %7, %cst_18 {dimension_numbers = #tpu.dot_dimension_numbers<[1], [0], [0], [1], [0, 0, 1, 1], [], []>} : vector<8x16xf32>, vector<16x64xf32>, vector<8x64xf32> -> vector<8x64xf32>
    %14 = arith.addf %12, %13 : vector<8x64xf32>
    %15 = math.tanh %14 : vector<8x64xf32>
    %16 = vector.extract_strided_slice %15 {offsets = [0, 0], sizes = [8, 16], strides = [1, 1]} : vector<8x64xf32> to vector<8x16xf32>
    %cst_19 = arith.constant 5.000000e-01 : f32
    %17 = vector.broadcast %cst_19 : f32 to vector<8x16xf32>
    %18 = arith.mulf %17, %16 : vector<8x16xf32>
    %cst_20 = arith.constant 5.000000e-01 : f32
    %19 = vector.broadcast %cst_20 : f32 to vector<8x16xf32>
    %20 = arith.addf %18, %19 : vector<8x16xf32>
    %21 = vector.extract_strided_slice %15 {offsets = [0, 16], sizes = [8, 16], strides = [1, 1]} : vector<8x64xf32> to vector<8x16xf32>
    %cst_21 = arith.constant 5.000000e-01 : f32
    %22 = vector.broadcast %cst_21 : f32 to vector<8x16xf32>
    %23 = arith.mulf %22, %21 : vector<8x16xf32>
    %cst_22 = arith.constant 5.000000e-01 : f32
    %24 = vector.broadcast %cst_22 : f32 to vector<8x16xf32>
    %25 = arith.addf %23, %24 : vector<8x16xf32>
    %26 = vector.extract_strided_slice %15 {offsets = [0, 32], sizes = [8, 16], strides = [1, 1]} : vector<8x64xf32> to vector<8x16xf32>
    %27 = vector.extract_strided_slice %15 {offsets = [0, 48], sizes = [8, 16], strides = [1, 1]} : vector<8x64xf32> to vector<8x16xf32>
    %cst_23 = arith.constant 5.000000e-01 : f32
    %28 = vector.broadcast %cst_23 : f32 to vector<8x16xf32>
    %29 = arith.mulf %28, %27 : vector<8x16xf32>
    %cst_24 = arith.constant 5.000000e-01 : f32
    %30 = vector.broadcast %cst_24 : f32 to vector<8x16xf32>
    %31 = arith.addf %29, %30 : vector<8x16xf32>
    %32 = arith.mulf %25, %11 : vector<8x16xf32>
    %33 = arith.mulf %20, %26 : vector<8x16xf32>
    %34 = arith.addf %32, %33 : vector<8x16xf32>
    %35 = math.tanh %34 : vector<8x16xf32>
    %36 = arith.mulf %31, %35 : vector<8x16xf32>
    %cst_25 = arith.constant dense<0.000000e+00> : vector<8x64xf32>
    %37 = tpu.matmul %36, %8, %cst_25 {dimension_numbers = #tpu.dot_dimension_numbers<[1], [0], [0], [1], [0, 0, 1, 1], [], []>} : vector<8x16xf32>, vector<16x64xf32>, vector<8x64xf32> -> vector<8x64xf32>
    %38 = arith.addf %37, %10 : vector<8x64xf32>
    %cst_26 = arith.constant dense<0.000000e+00> : vector<8x64xf32>
    %39 = tpu.matmul %11, %9, %cst_26 {dimension_numbers = #tpu.dot_dimension_numbers<[1], [0], [0], [1], [0, 0, 1, 1], [], []>} : vector<8x16xf32>, vector<16x64xf32>, vector<8x64xf32> -> vector<8x64xf32>
    %40 = arith.addf %38, %39 : vector<8x64xf32>
    %41 = math.tanh %40 : vector<8x64xf32>
    %42 = vector.extract_strided_slice %41 {offsets = [0, 0], sizes = [8, 16], strides = [1, 1]} : vector<8x64xf32> to vector<8x16xf32>
    %cst_27 = arith.constant 5.000000e-01 : f32
    %43 = vector.broadcast %cst_27 : f32 to vector<8x16xf32>
    %44 = arith.mulf %43, %42 : vector<8x16xf32>
    %cst_28 = arith.constant 5.000000e-01 : f32
    %45 = vector.broadcast %cst_28 : f32 to vector<8x16xf32>
    %46 = arith.addf %44, %45 : vector<8x16xf32>
    %47 = vector.extract_strided_slice %41 {offsets = [0, 16], sizes = [8, 16], strides = [1, 1]} : vector<8x64xf32> to vector<8x16xf32>
    %cst_29 = arith.constant 5.000000e-01 : f32
    %48 = vector.broadcast %cst_29 : f32 to vector<8x16xf32>
    %49 = arith.mulf %48, %47 : vector<8x16xf32>
    %cst_30 = arith.constant 5.000000e-01 : f32
    %50 = vector.broadcast %cst_30 : f32 to vector<8x16xf32>
    %51 = arith.addf %49, %50 : vector<8x16xf32>
    %52 = vector.extract_strided_slice %41 {offsets = [0, 32], sizes = [8, 16], strides = [1, 1]} : vector<8x64xf32> to vector<8x16xf32>
    %53 = vector.extract_strided_slice %41 {offsets = [0, 48], sizes = [8, 16], strides = [1, 1]} : vector<8x64xf32> to vector<8x16xf32>
    %cst_31 = arith.constant 5.000000e-01 : f32
    %54 = vector.broadcast %cst_31 : f32 to vector<8x16xf32>
    %55 = arith.mulf %54, %53 : vector<8x16xf32>
    %cst_32 = arith.constant 5.000000e-01 : f32
    %56 = vector.broadcast %cst_32 : f32 to vector<8x16xf32>
    %57 = arith.addf %55, %56 : vector<8x16xf32>
    %58 = arith.mulf %51, %11 : vector<8x16xf32>
    %59 = arith.mulf %46, %52 : vector<8x16xf32>
    %60 = arith.addf %58, %59 : vector<8x16xf32>
    %61 = math.tanh %60 : vector<8x16xf32>
    %62 = arith.mulf %57, %61 : vector<8x16xf32>
    %c0_33 = arith.constant 0 : index
    %c0_34 = arith.constant 0 : index
    %63 = vector.load %arg11[%c0_33, %c0_34] : memref<8x128xf32, #tpu.memory_space<vmem>>, vector<8x16xf32>
    tpu.vector_store %arg11[%c0_33, %c0_34], %62 {strides = array<i32>} : memref<8x128xf32, #tpu.memory_space<vmem>>, vector<8x16xf32>,
    %c8 = arith.constant 8 : index
    %c0_35 = arith.constant 0 : index
    %64 = vector.load %arg10[%c8, %c0_35] : memref<64x64xf32, #tpu.memory_space<vmem>>, vector<8x64xf32>
    %cst_36 = arith.constant dense<0.000000e+00> : vector<8x64xf32>
    %65 = tpu.matmul %36, %7, %cst_36 {dimension_numbers = #tpu.dot_dimension_numbers<[1], [0], [0], [1], [0, 0, 1, 1], [], []>} : vector<8x16xf32>, vector<16x64xf32>, vector<8x64xf32> -> vector<8x64xf32>
    %66 = arith.addf %64, %65 : vector<8x64xf32>
    %67 = math.tanh %66 : vector<8x64xf32>
    %68 = vector.extract_strided_slice %67 {offsets = [0, 0], sizes = [8, 16], strides = [1, 1]} : vector<8x64xf32> to vector<8x16xf32>
    %cst_37 = arith.constant 5.000000e-01 : f32
    %69 = vector.broadcast %cst_37 : f32 to vector<8x16xf32>
    %70 = arith.mulf %69, %68 : vector<8x16xf32>
    %cst_38 = arith.constant 5.000000e-01 : f32
    %71 = vector.broadcast %cst_38 : f32 to vector<8x16xf32>
    %72 = arith.addf %70, %71 : vector<8x16xf32>
    %73 = vector.extract_strided_slice %67 {offsets = [0, 16], sizes = [8, 16], strides = [1, 1]} : vector<8x64xf32> to vector<8x16xf32>
    %cst_39 = arith.constant 5.000000e-01 : f32
    %74 = vector.broadcast %cst_39 : f32 to vector<8x16xf32>
    %75 = arith.mulf %74, %73 : vector<8x16xf32>
    %cst_40 = arith.constant 5.000000e-01 : f32
    %76 = vector.broadcast %cst_40 : f32 to vector<8x16xf32>
    %77 = arith.addf %75, %76 : vector<8x16xf32>
    %78 = vector.extract_strided_slice %67 {offsets = [0, 32], sizes = [8, 16], strides = [1, 1]} : vector<8x64xf32> to vector<8x16xf32>
    %79 = vector.extract_strided_slice %67 {offsets = [0, 48], sizes = [8, 16], strides = [1, 1]} : vector<8x64xf32> to vector<8x16xf32>
    %cst_41 = arith.constant 5.000000e-01 : f32
    %80 = vector.broadcast %cst_41 : f32 to vector<8x16xf32>
    %81 = arith.mulf %80, %79 : vector<8x16xf32>
    %cst_42 = arith.constant 5.000000e-01 : f32
    %82 = vector.broadcast %cst_42 : f32 to vector<8x16xf32>
    %83 = arith.addf %81, %82 : vector<8x16xf32>
    %84 = arith.mulf %77, %34 : vector<8x16xf32>
    %85 = arith.mulf %72, %78 : vector<8x16xf32>
    %86 = arith.addf %84, %85 : vector<8x16xf32>
    %87 = math.tanh %86 : vector<8x16xf32>
    %88 = arith.mulf %83, %87 : vector<8x16xf32>
    %cst_43 = arith.constant dense<0.000000e+00> : vector<8x64xf32>
    %89 = tpu.matmul %88, %8, %cst_43 {dimension_numbers = #tpu.dot_dimension_numbers<[1], [0], [0], [1], [0, 0, 1, 1], [], []>} : vector<8x16xf32>, vector<16x64xf32>, vector<8x64xf32> -> vector<8x64xf32>
    %90 = arith.addf %89, %10 : vector<8x64xf32>
    %cst_44 = arith.constant dense<0.000000e+00> : vector<8x64xf32>
    %91 = tpu.matmul %62, %9, %cst_44 {dimension_numbers = #tpu.dot_dimension_numbers<[1], [0], [0], [1], [0, 0, 1, 1], [], []>} : vector<8x16xf32>, vector<16x64xf32>, vector<8x64xf32> -> vector<8x64xf32>
    %92 = arith.addf %90, %91 : vector<8x64xf32>
    %93 = math.tanh %92 : vector<8x64xf32>
    %94 = vector.extract_strided_slice %93 {offsets = [0, 0], sizes = [8, 16], strides = [1, 1]} : vector<8x64xf32> to vector<8x16xf32>
    %cst_45 = arith.constant 5.000000e-01 : f32
    %95 = vector.broadcast %cst_45 : f32 to vector<8x16xf32>
    %96 = arith.mulf %95, %94 : vector<8x16xf32>
    %cst_46 = arith.constant 5.000000e-01 : f32
    %97 = vector.broadcast %cst_46 : f32 to vector<8x16xf32>
    %98 = arith.addf %96, %97 : vector<8x16xf32>
    %99 = vector.extract_strided_slice %93 {offsets = [0, 16], sizes = [8, 16], strides = [1, 1]} : vector<8x64xf32> to vector<8x16xf32>
    %cst_47 = arith.constant 5.000000e-01 : f32
    %100 = vector.broadcast %cst_47 : f32 to vector<8x16xf32>
    %101 = arith.mulf %100, %99 : vector<8x16xf32>
    %cst_48 = arith.constant 5.000000e-01 : f32
    %102 = vector.broadcast %cst_48 : f32 to vector<8x16xf32>
    %103 = arith.addf %101, %102 : vector<8x16xf32>
    %104 = vector.extract_strided_slice %93 {offsets = [0, 32], sizes = [8, 16], strides = [1, 1]} : vector<8x64xf32> to vector<8x16xf32>
    %105 = vector.extract_strided_slice %93 {offsets = [0, 48], sizes = [8, 16], strides = [1, 1]} : vector<8x64xf32> to vector<8x16xf32>
    %cst_49 = arith.constant 5.000000e-01 : f32
    %106 = vector.broadcast %cst_49 : f32 to vector<8x16xf32>
    %107 = arith.mulf %106, %105 : vector<8x16xf32>
    %cst_50 = arith.constant 5.000000e-01 : f32
    %108 = vector.broadcast %cst_50 : f32 to vector<8x16xf32>
    %109 = arith.addf %107, %108 : vector<8x16xf32>
    %110 = arith.mulf %103, %60 : vector<8x16xf32>
    %111 = arith.mulf %98, %104 : vector<8x16xf32>
    %112 = arith.addf %110, %111 : vector<8x16xf32>
    %113 = math.tanh %112 : vector<8x16xf32>
    %114 = arith.mulf %109, %113 : vector<8x16xf32>
    %c0_51 = arith.constant 0 : index
    %c16 = arith.constant 16 : index
    %115 = vector.load %arg11[%c0_51, %c16] : memref<8x128xf32, #tpu.memory_space<vmem>>, vector<8x16xf32>
    tpu.vector_store %arg11[%c0_51, %c16], %114 {strides = array<i32>} : memref<8x128xf32, #tpu.memory_space<vmem>>, vector<8x16xf32>,
    %c16_52 = arith.constant 16 : index
    %c0_53 = arith.constant 0 : index
    %116 = vector.load %arg10[%c16_52, %c0_53] : memref<64x64xf32, #tpu.memory_space<vmem>>, vector<8x64xf32>
    %cst_54 = arith.constant dense<0.000000e+00> : vector<8x64xf32>
    %117 = tpu.matmul %88, %7, %cst_54 {dimension_numbers = #tpu.dot_dimension_numbers<[1], [0], [0], [1], [0, 0, 1, 1], [], []>} : vector<8x16xf32>, vector<16x64xf32>, vector<8x64xf32> -> vector<8x64xf32>
    %118 = arith.addf %116, %117 : vector<8x64xf32>
    %119 = math.tanh %118 : vector<8x64xf32>
    %120 = vector.extract_strided_slice %119 {offsets = [0, 0], sizes = [8, 16], strides = [1, 1]} : vector<8x64xf32> to vector<8x16xf32>
    %cst_55 = arith.constant 5.000000e-01 : f32
    %121 = vector.broadcast %cst_55 : f32 to vector<8x16xf32>
    %122 = arith.mulf %121, %120 : vector<8x16xf32>
    %cst_56 = arith.constant 5.000000e-01 : f32
    %123 = vector.broadcast %cst_56 : f32 to vector<8x16xf32>
    %124 = arith.addf %122, %123 : vector<8x16xf32>
    %125 = vector.extract_strided_slice %119 {offsets = [0, 16], sizes = [8, 16], strides = [1, 1]} : vector<8x64xf32> to vector<8x16xf32>
    %cst_57 = arith.constant 5.000000e-01 : f32
    %126 = vector.broadcast %cst_57 : f32 to vector<8x16xf32>
    %127 = arith.mulf %126, %125 : vector<8x16xf32>
    %cst_58 = arith.constant 5.000000e-01 : f32
    %128 = vector.broadcast %cst_58 : f32 to vector<8x16xf32>
    %129 = arith.addf %127, %128 : vector<8x16xf32>
    %130 = vector.extract_strided_slice %119 {offsets = [0, 32], sizes = [8, 16], strides = [1, 1]} : vector<8x64xf32> to vector<8x16xf32>
    %131 = vector.extract_strided_slice %119 {offsets = [0, 48], sizes = [8, 16], strides = [1, 1]} : vector<8x64xf32> to vector<8x16xf32>
    %cst_59 = arith.constant 5.000000e-01 : f32
    %132 = vector.broadcast %cst_59 : f32 to vector<8x16xf32>
    %133 = arith.mulf %132, %131 : vector<8x16xf32>
    %cst_60 = arith.constant 5.000000e-01 : f32
    %134 = vector.broadcast %cst_60 : f32 to vector<8x16xf32>
    %135 = arith.addf %133, %134 : vector<8x16xf32>
    %136 = arith.mulf %129, %86 : vector<8x16xf32>
    %137 = arith.mulf %124, %130 : vector<8x16xf32>
    %138 = arith.addf %136, %137 : vector<8x16xf32>
    %139 = math.tanh %138 : vector<8x16xf32>
    %140 = arith.mulf %135, %139 : vector<8x16xf32>
    %cst_61 = arith.constant dense<0.000000e+00> : vector<8x64xf32>
    %141 = tpu.matmul %140, %8, %cst_61 {dimension_numbers = #tpu.dot_dimension_numbers<[1], [0], [0], [1], [0, 0, 1, 1], [], []>} : vector<8x16xf32>, vector<16x64xf32>, vector<8x64xf32> -> vector<8x64xf32>
    %142 = arith.addf %141, %10 : vector<8x64xf32>
    %cst_62 = arith.constant dense<0.000000e+00> : vector<8x64xf32>
    %143 = tpu.matmul %114, %9, %cst_62 {dimension_numbers = #tpu.dot_dimension_numbers<[1], [0], [0], [1], [0, 0, 1, 1], [], []>} : vector<8x16xf32>, vector<16x64xf32>, vector<8x64xf32> -> vector<8x64xf32>
    %144 = arith.addf %142, %143 : vector<8x64xf32>
    %145 = math.tanh %144 : vector<8x64xf32>
    %146 = vector.extract_strided_slice %145 {offsets = [0, 0], sizes = [8, 16], strides = [1, 1]} : vector<8x64xf32> to vector<8x16xf32>
    %cst_63 = arith.constant 5.000000e-01 : f32
    %147 = vector.broadcast %cst_63 : f32 to vector<8x16xf32>
    %148 = arith.mulf %147, %146 : vector<8x16xf32>
    %cst_64 = arith.constant 5.000000e-01 : f32
    %149 = vector.broadcast %cst_64 : f32 to vector<8x16xf32>
    %150 = arith.addf %148, %149 : vector<8x16xf32>
    %151 = vector.extract_strided_slice %145 {offsets = [0, 16], sizes = [8, 16], strides = [1, 1]} : vector<8x64xf32> to vector<8x16xf32>
    %cst_65 = arith.constant 5.000000e-01 : f32
    %152 = vector.broadcast %cst_65 : f32 to vector<8x16xf32>
    %153 = arith.mulf %152, %151 : vector<8x16xf32>
    %cst_66 = arith.constant 5.000000e-01 : f32
    %154 = vector.broadcast %cst_66 : f32 to vector<8x16xf32>
    %155 = arith.addf %153, %154 : vector<8x16xf32>
    %156 = vector.extract_strided_slice %145 {offsets = [0, 32], sizes = [8, 16], strides = [1, 1]} : vector<8x64xf32> to vector<8x16xf32>
    %157 = vector.extract_strided_slice %145 {offsets = [0, 48], sizes = [8, 16], strides = [1, 1]} : vector<8x64xf32> to vector<8x16xf32>
    %cst_67 = arith.constant 5.000000e-01 : f32
    %158 = vector.broadcast %cst_67 : f32 to vector<8x16xf32>
    %159 = arith.mulf %158, %157 : vector<8x16xf32>
    %cst_68 = arith.constant 5.000000e-01 : f32
    %160 = vector.broadcast %cst_68 : f32 to vector<8x16xf32>
    %161 = arith.addf %159, %160 : vector<8x16xf32>
    %162 = arith.mulf %155, %112 : vector<8x16xf32>
    %163 = arith.mulf %150, %156 : vector<8x16xf32>
    %164 = arith.addf %162, %163 : vector<8x16xf32>
    %165 = math.tanh %164 : vector<8x16xf32>
    %166 = arith.mulf %161, %165 : vector<8x16xf32>
    %c0_69 = arith.constant 0 : index
    %c32 = arith.constant 32 : index
    %167 = vector.load %arg11[%c0_69, %c32] : memref<8x128xf32, #tpu.memory_space<vmem>>, vector<8x16xf32>
    tpu.vector_store %arg11[%c0_69, %c32], %166 {strides = array<i32>} : memref<8x128xf32, #tpu.memory_space<vmem>>, vector<8x16xf32>,
    %c24 = arith.constant 24 : index
    %c0_70 = arith.constant 0 : index
    %168 = vector.load %arg10[%c24, %c0_70] : memref<64x64xf32, #tpu.memory_space<vmem>>, vector<8x64xf32>
    %cst_71 = arith.constant dense<0.000000e+00> : vector<8x64xf32>
    %169 = tpu.matmul %140, %7, %cst_71 {dimension_numbers = #tpu.dot_dimension_numbers<[1], [0], [0], [1], [0, 0, 1, 1], [], []>} : vector<8x16xf32>, vector<16x64xf32>, vector<8x64xf32> -> vector<8x64xf32>
    %170 = arith.addf %168, %169 : vector<8x64xf32>
    %171 = math.tanh %170 : vector<8x64xf32>
    %172 = vector.extract_strided_slice %171 {offsets = [0, 0], sizes = [8, 16], strides = [1, 1]} : vector<8x64xf32> to vector<8x16xf32>
    %cst_72 = arith.constant 5.000000e-01 : f32
    %173 = vector.broadcast %cst_72 : f32 to vector<8x16xf32>
    %174 = arith.mulf %173, %172 : vector<8x16xf32>
    %cst_73 = arith.constant 5.000000e-01 : f32
    %175 = vector.broadcast %cst_73 : f32 to vector<8x16xf32>
    %176 = arith.addf %174, %175 : vector<8x16xf32>
    %177 = vector.extract_strided_slice %171 {offsets = [0, 16], sizes = [8, 16], strides = [1, 1]} : vector<8x64xf32> to vector<8x16xf32>
    %cst_74 = arith.constant 5.000000e-01 : f32
    %178 = vector.broadcast %cst_74 : f32 to vector<8x16xf32>
    %179 = arith.mulf %178, %177 : vector<8x16xf32>
    %cst_75 = arith.constant 5.000000e-01 : f32
    %180 = vector.broadcast %cst_75 : f32 to vector<8x16xf32>
    %181 = arith.addf %179, %180 : vector<8x16xf32>
    %182 = vector.extract_strided_slice %171 {offsets = [0, 32], sizes = [8, 16], strides = [1, 1]} : vector<8x64xf32> to vector<8x16xf32>
    %183 = vector.extract_strided_slice %171 {offsets = [0, 48], sizes = [8, 16], strides = [1, 1]} : vector<8x64xf32> to vector<8x16xf32>
    %cst_76 = arith.constant 5.000000e-01 : f32
    %184 = vector.broadcast %cst_76 : f32 to vector<8x16xf32>
    %185 = arith.mulf %184, %183 : vector<8x16xf32>
    %cst_77 = arith.constant 5.000000e-01 : f32
    %186 = vector.broadcast %cst_77 : f32 to vector<8x16xf32>
    %187 = arith.addf %185, %186 : vector<8x16xf32>
    %188 = arith.mulf %181, %138 : vector<8x16xf32>
    %189 = arith.mulf %176, %182 : vector<8x16xf32>
    %190 = arith.addf %188, %189 : vector<8x16xf32>
    %191 = math.tanh %190 : vector<8x16xf32>
    %192 = arith.mulf %187, %191 : vector<8x16xf32>
    %cst_78 = arith.constant dense<0.000000e+00> : vector<8x64xf32>
    %193 = tpu.matmul %192, %8, %cst_78 {dimension_numbers = #tpu.dot_dimension_numbers<[1], [0], [0], [1], [0, 0, 1, 1], [], []>} : vector<8x16xf32>, vector<16x64xf32>, vector<8x64xf32> -> vector<8x64xf32>
    %194 = arith.addf %193, %10 : vector<8x64xf32>
    %cst_79 = arith.constant dense<0.000000e+00> : vector<8x64xf32>
    %195 = tpu.matmul %166, %9, %cst_79 {dimension_numbers = #tpu.dot_dimension_numbers<[1], [0], [0], [1], [0, 0, 1, 1], [], []>} : vector<8x16xf32>, vector<16x64xf32>, vector<8x64xf32> -> vector<8x64xf32>
    %196 = arith.addf %194, %195 : vector<8x64xf32>
    %197 = math.tanh %196 : vector<8x64xf32>
    %198 = vector.extract_strided_slice %197 {offsets = [0, 0], sizes = [8, 16], strides = [1, 1]} : vector<8x64xf32> to vector<8x16xf32>
    %cst_80 = arith.constant 5.000000e-01 : f32
    %199 = vector.broadcast %cst_80 : f32 to vector<8x16xf32>
    %200 = arith.mulf %199, %198 : vector<8x16xf32>
    %cst_81 = arith.constant 5.000000e-01 : f32
    %201 = vector.broadcast %cst_81 : f32 to vector<8x16xf32>
    %202 = arith.addf %200, %201 : vector<8x16xf32>
    %203 = vector.extract_strided_slice %197 {offsets = [0, 16], sizes = [8, 16], strides = [1, 1]} : vector<8x64xf32> to vector<8x16xf32>
    %cst_82 = arith.constant 5.000000e-01 : f32
    %204 = vector.broadcast %cst_82 : f32 to vector<8x16xf32>
    %205 = arith.mulf %204, %203 : vector<8x16xf32>
    %cst_83 = arith.constant 5.000000e-01 : f32
    %206 = vector.broadcast %cst_83 : f32 to vector<8x16xf32>
    %207 = arith.addf %205, %206 : vector<8x16xf32>
    %208 = vector.extract_strided_slice %197 {offsets = [0, 32], sizes = [8, 16], strides = [1, 1]} : vector<8x64xf32> to vector<8x16xf32>
    %209 = vector.extract_strided_slice %197 {offsets = [0, 48], sizes = [8, 16], strides = [1, 1]} : vector<8x64xf32> to vector<8x16xf32>
    %cst_84 = arith.constant 5.000000e-01 : f32
    %210 = vector.broadcast %cst_84 : f32 to vector<8x16xf32>
    %211 = arith.mulf %210, %209 : vector<8x16xf32>
    %cst_85 = arith.constant 5.000000e-01 : f32
    %212 = vector.broadcast %cst_85 : f32 to vector<8x16xf32>
    %213 = arith.addf %211, %212 : vector<8x16xf32>
    %214 = arith.mulf %207, %164 : vector<8x16xf32>
    %215 = arith.mulf %202, %208 : vector<8x16xf32>
    %216 = arith.addf %214, %215 : vector<8x16xf32>
    %217 = math.tanh %216 : vector<8x16xf32>
    %218 = arith.mulf %213, %217 : vector<8x16xf32>
    %c0_86 = arith.constant 0 : index
    %c48 = arith.constant 48 : index
    %219 = vector.load %arg11[%c0_86, %c48] : memref<8x128xf32, #tpu.memory_space<vmem>>, vector<8x16xf32>
    tpu.vector_store %arg11[%c0_86, %c48], %218 {strides = array<i32>} : memref<8x128xf32, #tpu.memory_space<vmem>>, vector<8x16xf32>,
    %c32_87 = arith.constant 32 : index
    %c0_88 = arith.constant 0 : index
    %220 = vector.load %arg10[%c32_87, %c0_88] : memref<64x64xf32, #tpu.memory_space<vmem>>, vector<8x64xf32>
    %cst_89 = arith.constant dense<0.000000e+00> : vector<8x64xf32>
    %221 = tpu.matmul %192, %7, %cst_89 {dimension_numbers = #tpu.dot_dimension_numbers<[1], [0], [0], [1], [0, 0, 1, 1], [], []>} : vector<8x16xf32>, vector<16x64xf32>, vector<8x64xf32> -> vector<8x64xf32>
    %222 = arith.addf %220, %221 : vector<8x64xf32>
    %223 = math.tanh %222 : vector<8x64xf32>
    %224 = vector.extract_strided_slice %223 {offsets = [0, 0], sizes = [8, 16], strides = [1, 1]} : vector<8x64xf32> to vector<8x16xf32>
    %cst_90 = arith.constant 5.000000e-01 : f32
    %225 = vector.broadcast %cst_90 : f32 to vector<8x16xf32>
    %226 = arith.mulf %225, %224 : vector<8x16xf32>
    %cst_91 = arith.constant 5.000000e-01 : f32
    %227 = vector.broadcast %cst_91 : f32 to vector<8x16xf32>
    %228 = arith.addf %226, %227 : vector<8x16xf32>
    %229 = vector.extract_strided_slice %223 {offsets = [0, 16], sizes = [8, 16], strides = [1, 1]} : vector<8x64xf32> to vector<8x16xf32>
    %cst_92 = arith.constant 5.000000e-01 : f32
    %230 = vector.broadcast %cst_92 : f32 to vector<8x16xf32>
    %231 = arith.mulf %230, %229 : vector<8x16xf32>
    %cst_93 = arith.constant 5.000000e-01 : f32
    %232 = vector.broadcast %cst_93 : f32 to vector<8x16xf32>
    %233 = arith.addf %231, %232 : vector<8x16xf32>
    %234 = vector.extract_strided_slice %223 {offsets = [0, 32], sizes = [8, 16], strides = [1, 1]} : vector<8x64xf32> to vector<8x16xf32>
    %235 = vector.extract_strided_slice %223 {offsets = [0, 48], sizes = [8, 16], strides = [1, 1]} : vector<8x64xf32> to vector<8x16xf32>
    %cst_94 = arith.constant 5.000000e-01 : f32
    %236 = vector.broadcast %cst_94 : f32 to vector<8x16xf32>
    %237 = arith.mulf %236, %235 : vector<8x16xf32>
    %cst_95 = arith.constant 5.000000e-01 : f32
    %238 = vector.broadcast %cst_95 : f32 to vector<8x16xf32>
    %239 = arith.addf %237, %238 : vector<8x16xf32>
    %240 = arith.mulf %233, %190 : vector<8x16xf32>
    %241 = arith.mulf %228, %234 : vector<8x16xf32>
    %242 = arith.addf %240, %241 : vector<8x16xf32>
    %243 = math.tanh %242 : vector<8x16xf32>
    %244 = arith.mulf %239, %243 : vector<8x16xf32>
    %cst_96 = arith.constant dense<0.000000e+00> : vector<8x64xf32>
    %245 = tpu.matmul %244, %8, %cst_96 {dimension_numbers = #tpu.dot_dimension_numbers<[1], [0], [0], [1], [0, 0, 1, 1], [], []>} : vector<8x16xf32>, vector<16x64xf32>, vector<8x64xf32> -> vector<8x64xf32>
    %246 = arith.addf %245, %10 : vector<8x64xf32>
    %cst_97 = arith.constant dense<0.000000e+00> : vector<8x64xf32>
    %247 = tpu.matmul %218, %9, %cst_97 {dimension_numbers = #tpu.dot_dimension_numbers<[1], [0], [0], [1], [0, 0, 1, 1], [], []>} : vector<8x16xf32>, vector<16x64xf32>, vector<8x64xf32> -> vector<8x64xf32>
    %248 = arith.addf %246, %247 : vector<8x64xf32>
    %249 = math.tanh %248 : vector<8x64xf32>
    %250 = vector.extract_strided_slice %249 {offsets = [0, 0], sizes = [8, 16], strides = [1, 1]} : vector<8x64xf32> to vector<8x16xf32>
    %cst_98 = arith.constant 5.000000e-01 : f32
    %251 = vector.broadcast %cst_98 : f32 to vector<8x16xf32>
    %252 = arith.mulf %251, %250 : vector<8x16xf32>
    %cst_99 = arith.constant 5.000000e-01 : f32
    %253 = vector.broadcast %cst_99 : f32 to vector<8x16xf32>
    %254 = arith.addf %252, %253 : vector<8x16xf32>
    %255 = vector.extract_strided_slice %249 {offsets = [0, 16], sizes = [8, 16], strides = [1, 1]} : vector<8x64xf32> to vector<8x16xf32>
    %cst_100 = arith.constant 5.000000e-01 : f32
    %256 = vector.broadcast %cst_100 : f32 to vector<8x16xf32>
    %257 = arith.mulf %256, %255 : vector<8x16xf32>
    %cst_101 = arith.constant 5.000000e-01 : f32
    %258 = vector.broadcast %cst_101 : f32 to vector<8x16xf32>
    %259 = arith.addf %257, %258 : vector<8x16xf32>
    %260 = vector.extract_strided_slice %249 {offsets = [0, 32], sizes = [8, 16], strides = [1, 1]} : vector<8x64xf32> to vector<8x16xf32>
    %261 = vector.extract_strided_slice %249 {offsets = [0, 48], sizes = [8, 16], strides = [1, 1]} : vector<8x64xf32> to vector<8x16xf32>
    %cst_102 = arith.constant 5.000000e-01 : f32
    %262 = vector.broadcast %cst_102 : f32 to vector<8x16xf32>
    %263 = arith.mulf %262, %261 : vector<8x16xf32>
    %cst_103 = arith.constant 5.000000e-01 : f32
    %264 = vector.broadcast %cst_103 : f32 to vector<8x16xf32>
    %265 = arith.addf %263, %264 : vector<8x16xf32>
    %266 = arith.mulf %259, %216 : vector<8x16xf32>
    %267 = arith.mulf %254, %260 : vector<8x16xf32>
    %268 = arith.addf %266, %267 : vector<8x16xf32>
    %269 = math.tanh %268 : vector<8x16xf32>
    %270 = arith.mulf %265, %269 : vector<8x16xf32>
    %c0_104 = arith.constant 0 : index
    %c64 = arith.constant 64 : index
    %271 = vector.load %arg11[%c0_104, %c64] : memref<8x128xf32, #tpu.memory_space<vmem>>, vector<8x16xf32>
    tpu.vector_store %arg11[%c0_104, %c64], %270 {strides = array<i32>} : memref<8x128xf32, #tpu.memory_space<vmem>>, vector<8x16xf32>,
    %c40 = arith.constant 40 : index
    %c0_105 = arith.constant 0 : index
    %272 = vector.load %arg10[%c40, %c0_105] : memref<64x64xf32, #tpu.memory_space<vmem>>, vector<8x64xf32>
    %cst_106 = arith.constant dense<0.000000e+00> : vector<8x64xf32>
    %273 = tpu.matmul %244, %7, %cst_106 {dimension_numbers = #tpu.dot_dimension_numbers<[1], [0], [0], [1], [0, 0, 1, 1], [], []>} : vector<8x16xf32>, vector<16x64xf32>, vector<8x64xf32> -> vector<8x64xf32>
    %274 = arith.addf %272, %273 : vector<8x64xf32>
    %275 = math.tanh %274 : vector<8x64xf32>
    %276 = vector.extract_strided_slice %275 {offsets = [0, 0], sizes = [8, 16], strides = [1, 1]} : vector<8x64xf32> to vector<8x16xf32>
    %cst_107 = arith.constant 5.000000e-01 : f32
    %277 = vector.broadcast %cst_107 : f32 to vector<8x16xf32>
    %278 = arith.mulf %277, %276 : vector<8x16xf32>
    %cst_108 = arith.constant 5.000000e-01 : f32
    %279 = vector.broadcast %cst_108 : f32 to vector<8x16xf32>
    %280 = arith.addf %278, %279 : vector<8x16xf32>
    %281 = vector.extract_strided_slice %275 {offsets = [0, 16], sizes = [8, 16], strides = [1, 1]} : vector<8x64xf32> to vector<8x16xf32>
    %cst_109 = arith.constant 5.000000e-01 : f32
    %282 = vector.broadcast %cst_109 : f32 to vector<8x16xf32>
    %283 = arith.mulf %282, %281 : vector<8x16xf32>
    %cst_110 = arith.constant 5.000000e-01 : f32
    %284 = vector.broadcast %cst_110 : f32 to vector<8x16xf32>
    %285 = arith.addf %283, %284 : vector<8x16xf32>
    %286 = vector.extract_strided_slice %275 {offsets = [0, 32], sizes = [8, 16], strides = [1, 1]} : vector<8x64xf32> to vector<8x16xf32>
    %287 = vector.extract_strided_slice %275 {offsets = [0, 48], sizes = [8, 16], strides = [1, 1]} : vector<8x64xf32> to vector<8x16xf32>
    %cst_111 = arith.constant 5.000000e-01 : f32
    %288 = vector.broadcast %cst_111 : f32 to vector<8x16xf32>
    %289 = arith.mulf %288, %287 : vector<8x16xf32>
    %cst_112 = arith.constant 5.000000e-01 : f32
    %290 = vector.broadcast %cst_112 : f32 to vector<8x16xf32>
    %291 = arith.addf %289, %290 : vector<8x16xf32>
    %292 = arith.mulf %285, %242 : vector<8x16xf32>
    %293 = arith.mulf %280, %286 : vector<8x16xf32>
    %294 = arith.addf %292, %293 : vector<8x16xf32>
    %295 = math.tanh %294 : vector<8x16xf32>
    %296 = arith.mulf %291, %295 : vector<8x16xf32>
    %cst_113 = arith.constant dense<0.000000e+00> : vector<8x64xf32>
    %297 = tpu.matmul %296, %8, %cst_113 {dimension_numbers = #tpu.dot_dimension_numbers<[1], [0], [0], [1], [0, 0, 1, 1], [], []>} : vector<8x16xf32>, vector<16x64xf32>, vector<8x64xf32> -> vector<8x64xf32>
    %298 = arith.addf %297, %10 : vector<8x64xf32>
    %cst_114 = arith.constant dense<0.000000e+00> : vector<8x64xf32>
    %299 = tpu.matmul %270, %9, %cst_114 {dimension_numbers = #tpu.dot_dimension_numbers<[1], [0], [0], [1], [0, 0, 1, 1], [], []>} : vector<8x16xf32>, vector<16x64xf32>, vector<8x64xf32> -> vector<8x64xf32>
    %300 = arith.addf %298, %299 : vector<8x64xf32>
    %301 = math.tanh %300 : vector<8x64xf32>
    %302 = vector.extract_strided_slice %301 {offsets = [0, 0], sizes = [8, 16], strides = [1, 1]} : vector<8x64xf32> to vector<8x16xf32>
    %cst_115 = arith.constant 5.000000e-01 : f32
    %303 = vector.broadcast %cst_115 : f32 to vector<8x16xf32>
    %304 = arith.mulf %303, %302 : vector<8x16xf32>
    %cst_116 = arith.constant 5.000000e-01 : f32
    %305 = vector.broadcast %cst_116 : f32 to vector<8x16xf32>
    %306 = arith.addf %304, %305 : vector<8x16xf32>
    %307 = vector.extract_strided_slice %301 {offsets = [0, 16], sizes = [8, 16], strides = [1, 1]} : vector<8x64xf32> to vector<8x16xf32>
    %cst_117 = arith.constant 5.000000e-01 : f32
    %308 = vector.broadcast %cst_117 : f32 to vector<8x16xf32>
    %309 = arith.mulf %308, %307 : vector<8x16xf32>
    %cst_118 = arith.constant 5.000000e-01 : f32
    %310 = vector.broadcast %cst_118 : f32 to vector<8x16xf32>
    %311 = arith.addf %309, %310 : vector<8x16xf32>
    %312 = vector.extract_strided_slice %301 {offsets = [0, 32], sizes = [8, 16], strides = [1, 1]} : vector<8x64xf32> to vector<8x16xf32>
    %313 = vector.extract_strided_slice %301 {offsets = [0, 48], sizes = [8, 16], strides = [1, 1]} : vector<8x64xf32> to vector<8x16xf32>
    %cst_119 = arith.constant 5.000000e-01 : f32
    %314 = vector.broadcast %cst_119 : f32 to vector<8x16xf32>
    %315 = arith.mulf %314, %313 : vector<8x16xf32>
    %cst_120 = arith.constant 5.000000e-01 : f32
    %316 = vector.broadcast %cst_120 : f32 to vector<8x16xf32>
    %317 = arith.addf %315, %316 : vector<8x16xf32>
    %318 = arith.mulf %311, %268 : vector<8x16xf32>
    %319 = arith.mulf %306, %312 : vector<8x16xf32>
    %320 = arith.addf %318, %319 : vector<8x16xf32>
    %321 = math.tanh %320 : vector<8x16xf32>
    %322 = arith.mulf %317, %321 : vector<8x16xf32>
    %c0_121 = arith.constant 0 : index
    %c80 = arith.constant 80 : index
    %323 = vector.load %arg11[%c0_121, %c80] : memref<8x128xf32, #tpu.memory_space<vmem>>, vector<8x16xf32>
    tpu.vector_store %arg11[%c0_121, %c80], %322 {strides = array<i32>} : memref<8x128xf32, #tpu.memory_space<vmem>>, vector<8x16xf32>,
    %c48_122 = arith.constant 48 : index
    %c0_123 = arith.constant 0 : index
    %324 = vector.load %arg10[%c48_122, %c0_123] : memref<64x64xf32, #tpu.memory_space<vmem>>, vector<8x64xf32>
    %cst_124 = arith.constant dense<0.000000e+00> : vector<8x64xf32>
    %325 = tpu.matmul %296, %7, %cst_124 {dimension_numbers = #tpu.dot_dimension_numbers<[1], [0], [0], [1], [0, 0, 1, 1], [], []>} : vector<8x16xf32>, vector<16x64xf32>, vector<8x64xf32> -> vector<8x64xf32>
    %326 = arith.addf %324, %325 : vector<8x64xf32>
    %327 = math.tanh %326 : vector<8x64xf32>
    %328 = vector.extract_strided_slice %327 {offsets = [0, 0], sizes = [8, 16], strides = [1, 1]} : vector<8x64xf32> to vector<8x16xf32>
    %cst_125 = arith.constant 5.000000e-01 : f32
    %329 = vector.broadcast %cst_125 : f32 to vector<8x16xf32>
    %330 = arith.mulf %329, %328 : vector<8x16xf32>
    %cst_126 = arith.constant 5.000000e-01 : f32
    %331 = vector.broadcast %cst_126 : f32 to vector<8x16xf32>
    %332 = arith.addf %330, %331 : vector<8x16xf32>
    %333 = vector.extract_strided_slice %327 {offsets = [0, 16], sizes = [8, 16], strides = [1, 1]} : vector<8x64xf32> to vector<8x16xf32>
    %cst_127 = arith.constant 5.000000e-01 : f32
    %334 = vector.broadcast %cst_127 : f32 to vector<8x16xf32>
    %335 = arith.mulf %334, %333 : vector<8x16xf32>
    %cst_128 = arith.constant 5.000000e-01 : f32
    %336 = vector.broadcast %cst_128 : f32 to vector<8x16xf32>
    %337 = arith.addf %335, %336 : vector<8x16xf32>
    %338 = vector.extract_strided_slice %327 {offsets = [0, 32], sizes = [8, 16], strides = [1, 1]} : vector<8x64xf32> to vector<8x16xf32>
    %339 = vector.extract_strided_slice %327 {offsets = [0, 48], sizes = [8, 16], strides = [1, 1]} : vector<8x64xf32> to vector<8x16xf32>
    %cst_129 = arith.constant 5.000000e-01 : f32
    %340 = vector.broadcast %cst_129 : f32 to vector<8x16xf32>
    %341 = arith.mulf %340, %339 : vector<8x16xf32>
    %cst_130 = arith.constant 5.000000e-01 : f32
    %342 = vector.broadcast %cst_130 : f32 to vector<8x16xf32>
    %343 = arith.addf %341, %342 : vector<8x16xf32>
    %344 = arith.mulf %337, %294 : vector<8x16xf32>
    %345 = arith.mulf %332, %338 : vector<8x16xf32>
    %346 = arith.addf %344, %345 : vector<8x16xf32>
    %347 = math.tanh %346 : vector<8x16xf32>
    %348 = arith.mulf %343, %347 : vector<8x16xf32>
    %cst_131 = arith.constant dense<0.000000e+00> : vector<8x64xf32>
    %349 = tpu.matmul %348, %8, %cst_131 {dimension_numbers = #tpu.dot_dimension_numbers<[1], [0], [0], [1], [0, 0, 1, 1], [], []>} : vector<8x16xf32>, vector<16x64xf32>, vector<8x64xf32> -> vector<8x64xf32>
    %350 = arith.addf %349, %10 : vector<8x64xf32>
    %cst_132 = arith.constant dense<0.000000e+00> : vector<8x64xf32>
    %351 = tpu.matmul %322, %9, %cst_132 {dimension_numbers = #tpu.dot_dimension_numbers<[1], [0], [0], [1], [0, 0, 1, 1], [], []>} : vector<8x16xf32>, vector<16x64xf32>, vector<8x64xf32> -> vector<8x64xf32>
    %352 = arith.addf %350, %351 : vector<8x64xf32>
    %353 = math.tanh %352 : vector<8x64xf32>
    %354 = vector.extract_strided_slice %353 {offsets = [0, 0], sizes = [8, 16], strides = [1, 1]} : vector<8x64xf32> to vector<8x16xf32>
    %cst_133 = arith.constant 5.000000e-01 : f32
    %355 = vector.broadcast %cst_133 : f32 to vector<8x16xf32>
    %356 = arith.mulf %355, %354 : vector<8x16xf32>
    %cst_134 = arith.constant 5.000000e-01 : f32
    %357 = vector.broadcast %cst_134 : f32 to vector<8x16xf32>
    %358 = arith.addf %356, %357 : vector<8x16xf32>
    %359 = vector.extract_strided_slice %353 {offsets = [0, 16], sizes = [8, 16], strides = [1, 1]} : vector<8x64xf32> to vector<8x16xf32>
    %cst_135 = arith.constant 5.000000e-01 : f32
    %360 = vector.broadcast %cst_135 : f32 to vector<8x16xf32>
    %361 = arith.mulf %360, %359 : vector<8x16xf32>
    %cst_136 = arith.constant 5.000000e-01 : f32
    %362 = vector.broadcast %cst_136 : f32 to vector<8x16xf32>
    %363 = arith.addf %361, %362 : vector<8x16xf32>
    %364 = vector.extract_strided_slice %353 {offsets = [0, 32], sizes = [8, 16], strides = [1, 1]} : vector<8x64xf32> to vector<8x16xf32>
    %365 = vector.extract_strided_slice %353 {offsets = [0, 48], sizes = [8, 16], strides = [1, 1]} : vector<8x64xf32> to vector<8x16xf32>
    %cst_137 = arith.constant 5.000000e-01 : f32
    %366 = vector.broadcast %cst_137 : f32 to vector<8x16xf32>
    %367 = arith.mulf %366, %365 : vector<8x16xf32>
    %cst_138 = arith.constant 5.000000e-01 : f32
    %368 = vector.broadcast %cst_138 : f32 to vector<8x16xf32>
    %369 = arith.addf %367, %368 : vector<8x16xf32>
    %370 = arith.mulf %363, %320 : vector<8x16xf32>
    %371 = arith.mulf %358, %364 : vector<8x16xf32>
    %372 = arith.addf %370, %371 : vector<8x16xf32>
    %373 = math.tanh %372 : vector<8x16xf32>
    %374 = arith.mulf %369, %373 : vector<8x16xf32>
    %c0_139 = arith.constant 0 : index
    %c96 = arith.constant 96 : index
    %375 = vector.load %arg11[%c0_139, %c96] : memref<8x128xf32, #tpu.memory_space<vmem>>, vector<8x16xf32>
    tpu.vector_store %arg11[%c0_139, %c96], %374 {strides = array<i32>} : memref<8x128xf32, #tpu.memory_space<vmem>>, vector<8x16xf32>,
    %c56 = arith.constant 56 : index
    %c0_140 = arith.constant 0 : index
    %376 = vector.load %arg10[%c56, %c0_140] : memref<64x64xf32, #tpu.memory_space<vmem>>, vector<8x64xf32>
    %cst_141 = arith.constant dense<0.000000e+00> : vector<8x64xf32>
    %377 = tpu.matmul %348, %7, %cst_141 {dimension_numbers = #tpu.dot_dimension_numbers<[1], [0], [0], [1], [0, 0, 1, 1], [], []>} : vector<8x16xf32>, vector<16x64xf32>, vector<8x64xf32> -> vector<8x64xf32>
    %378 = arith.addf %376, %377 : vector<8x64xf32>
    %379 = math.tanh %378 : vector<8x64xf32>
    %380 = vector.extract_strided_slice %379 {offsets = [0, 0], sizes = [8, 16], strides = [1, 1]} : vector<8x64xf32> to vector<8x16xf32>
    %cst_142 = arith.constant 5.000000e-01 : f32
    %381 = vector.broadcast %cst_142 : f32 to vector<8x16xf32>
    %382 = arith.mulf %381, %380 : vector<8x16xf32>
    %cst_143 = arith.constant 5.000000e-01 : f32
    %383 = vector.broadcast %cst_143 : f32 to vector<8x16xf32>
    %384 = arith.addf %382, %383 : vector<8x16xf32>
    %385 = vector.extract_strided_slice %379 {offsets = [0, 16], sizes = [8, 16], strides = [1, 1]} : vector<8x64xf32> to vector<8x16xf32>
    %cst_144 = arith.constant 5.000000e-01 : f32
    %386 = vector.broadcast %cst_144 : f32 to vector<8x16xf32>
    %387 = arith.mulf %386, %385 : vector<8x16xf32>
    %cst_145 = arith.constant 5.000000e-01 : f32
    %388 = vector.broadcast %cst_145 : f32 to vector<8x16xf32>
    %389 = arith.addf %387, %388 : vector<8x16xf32>
    %390 = vector.extract_strided_slice %379 {offsets = [0, 32], sizes = [8, 16], strides = [1, 1]} : vector<8x64xf32> to vector<8x16xf32>
    %391 = vector.extract_strided_slice %379 {offsets = [0, 48], sizes = [8, 16], strides = [1, 1]} : vector<8x64xf32> to vector<8x16xf32>
    %cst_146 = arith.constant 5.000000e-01 : f32
    %392 = vector.broadcast %cst_146 : f32 to vector<8x16xf32>
    %393 = arith.mulf %392, %391 : vector<8x16xf32>
    %cst_147 = arith.constant 5.000000e-01 : f32
    %394 = vector.broadcast %cst_147 : f32 to vector<8x16xf32>
    %395 = arith.addf %393, %394 : vector<8x16xf32>
    %396 = arith.mulf %389, %346 : vector<8x16xf32>
    %397 = arith.mulf %384, %390 : vector<8x16xf32>
    %398 = arith.addf %396, %397 : vector<8x16xf32>
    %399 = math.tanh %398 : vector<8x16xf32>
    %400 = arith.mulf %395, %399 : vector<8x16xf32>
    %cst_148 = arith.constant dense<0.000000e+00> : vector<8x64xf32>
    %401 = tpu.matmul %400, %8, %cst_148 {dimension_numbers = #tpu.dot_dimension_numbers<[1], [0], [0], [1], [0, 0, 1, 1], [], []>} : vector<8x16xf32>, vector<16x64xf32>, vector<8x64xf32> -> vector<8x64xf32>
    %402 = arith.addf %401, %10 : vector<8x64xf32>
    %cst_149 = arith.constant dense<0.000000e+00> : vector<8x64xf32>
    %403 = tpu.matmul %374, %9, %cst_149 {dimension_numbers = #tpu.dot_dimension_numbers<[1], [0], [0], [1], [0, 0, 1, 1], [], []>} : vector<8x16xf32>, vector<16x64xf32>, vector<8x64xf32> -> vector<8x64xf32>
    %404 = arith.addf %402, %403 : vector<8x64xf32>
    %405 = math.tanh %404 : vector<8x64xf32>
    %406 = vector.extract_strided_slice %405 {offsets = [0, 0], sizes = [8, 16], strides = [1, 1]} : vector<8x64xf32> to vector<8x16xf32>
    %cst_150 = arith.constant 5.000000e-01 : f32
    %407 = vector.broadcast %cst_150 : f32 to vector<8x16xf32>
    %408 = arith.mulf %407, %406 : vector<8x16xf32>
    %cst_151 = arith.constant 5.000000e-01 : f32
    %409 = vector.broadcast %cst_151 : f32 to vector<8x16xf32>
    %410 = arith.addf %408, %409 : vector<8x16xf32>
    %411 = vector.extract_strided_slice %405 {offsets = [0, 16], sizes = [8, 16], strides = [1, 1]} : vector<8x64xf32> to vector<8x16xf32>
    %cst_152 = arith.constant 5.000000e-01 : f32
    %412 = vector.broadcast %cst_152 : f32 to vector<8x16xf32>
    %413 = arith.mulf %412, %411 : vector<8x16xf32>
    %cst_153 = arith.constant 5.000000e-01 : f32
    %414 = vector.broadcast %cst_153 : f32 to vector<8x16xf32>
    %415 = arith.addf %413, %414 : vector<8x16xf32>
    %416 = vector.extract_strided_slice %405 {offsets = [0, 32], sizes = [8, 16], strides = [1, 1]} : vector<8x64xf32> to vector<8x16xf32>
    %417 = vector.extract_strided_slice %405 {offsets = [0, 48], sizes = [8, 16], strides = [1, 1]} : vector<8x64xf32> to vector<8x16xf32>
    %cst_154 = arith.constant 5.000000e-01 : f32
    %418 = vector.broadcast %cst_154 : f32 to vector<8x16xf32>
    %419 = arith.mulf %418, %417 : vector<8x16xf32>
    %cst_155 = arith.constant 5.000000e-01 : f32
    %420 = vector.broadcast %cst_155 : f32 to vector<8x16xf32>
    %421 = arith.addf %419, %420 : vector<8x16xf32>
    %422 = arith.mulf %415, %372 : vector<8x16xf32>
    %423 = arith.mulf %410, %416 : vector<8x16xf32>
    %424 = arith.addf %422, %423 : vector<8x16xf32>
    %425 = math.tanh %424 : vector<8x16xf32>
    %426 = arith.mulf %421, %425 : vector<8x16xf32>
    %c0_156 = arith.constant 0 : index
    %c112 = arith.constant 112 : index
    %427 = vector.load %arg11[%c0_156, %c112] : memref<8x128xf32, #tpu.memory_space<vmem>>, vector<8x16xf32>
    tpu.vector_store %arg11[%c0_156, %c112], %426 {strides = array<i32>} : memref<8x128xf32, #tpu.memory_space<vmem>>, vector<8x16xf32>,
    %c0_157 = arith.constant 0 : index
    %c0_158 = arith.constant 0 : index
    %428 = vector.load %arg11[%c0_157, %c0_158] : memref<8x128xf32, #tpu.memory_space<vmem>>, vector<8x128xf32>
    %c0_159 = arith.constant 0 : index
    %c0_160 = arith.constant 0 : index
    %429 = vector.load %arg1[%c0_159, %c0_160] : memref<8x128xf32, #tpu.memory_space<vmem>>, vector<8x128xf32>
    %430 = arith.mulf %428, %429 : vector<8x128xf32>
    %431 = arith.mulf %430, %430 : vector<8x128xf32>
    %c0_161 = arith.constant 0 : index
    %c0_162 = arith.constant 0 : index
    %432 = vector.load %arg2[%c0_161, %c0_162] : memref<128x128xf32, #tpu.memory_space<vmem>>, vector<128x128xf32>
    %cst_163 = arith.constant dense<0.000000e+00> : vector<8x128xf32>
    %433 = tpu.matmul %431, %432, %cst_163 {dimension_numbers = #tpu.dot_dimension_numbers<[1], [0], [0], [1], [0, 0, 1, 1], [], []>} : vector<8x128xf32>, vector<128x128xf32>, vector<8x128xf32> -> vector<8x128xf32>
    %cst_164 = arith.constant 1.000000e-24 : f32
    %434 = vector.broadcast %cst_164 : f32 to vector<8x128xf32>
    %435 = arith.maximumf %433, %434 : vector<8x128xf32>
    %436 = math.rsqrt %435 : vector<8x128xf32>
    %437 = arith.mulf %430, %436 : vector<8x128xf32>
    %c0_165 = arith.constant 0 : index
    %c0_166 = arith.constant 0 : index
    %438 = vector.load %arg9[%c0_165, %c0_166] : memref<8x128xf32, #tpu.memory_space<vmem>>, vector<8x128xf32>
    tpu.vector_store %arg9[%c0_165, %c0_166], %437 {strides = array<i32>} : memref<8x128xf32, #tpu.memory_space<vmem>>, vector<8x128xf32>,
    return
  }
}

</mosaic_0001>

<bundles_post_ra>
// kernel: tpu_custom_call.1
= control target key start
LH: loop header
LB: loop body
LE: loop exit
PB: predicated region body
PF: predicated region fallthrough
CT: control target
= control target key end

     0   :  { %14 = vsyncpa [#allocation5], 0  ;;  %s3474_s0 = inlined_call_operand.vmem [shape: f32[64,32], index: 0, kind: input, shape index: {}]   ;;  %s3475_s1 = inlined_call_operand.vmem [shape: f32[8,128], index: 1, kind: input, shape index: {}]   ;;  %s3476_s2 = inlined_call_operand.hbm [shape: f32[128,128], index: 2, kind: input, shape index: {}]   ;;  %s3477_s3 = inlined_call_operand.vmem [shape: f32[32,64], index: 3, kind: input, shape index: {}]   ;;  %s3478_s4 = inlined_call_operand.vmem [shape: f32[16,64], index: 4, kind: input, shape index: {}]   ;;  %s3479_s5 = inlined_call_operand.vmem [shape: f32[1,64], index: 5, kind: input, shape index: {}]   ;;  %s3480_s6 = inlined_call_operand.vmem [shape: f32[16,64], index: 6, kind: input, shape index: {}]   ;;  %s3481_s7 = inlined_call_operand.vmem [shape: f32[16,64], index: 7, kind: input, shape index: {}]   ;;  %s3482_s8 = inlined_call_operand.vmem [shape: f32[8,64], index: 8, kind: input, shape index: {}]   ;;  %s3483_s9 = inlined_call_operand.hbm [shape: f32[8,128], index: 9, kind: output, shape index: {}]  }
   0x1   :  { %15 = vsyncpa [#allocation6], 0  ;;  %s3074_s30 = smov [#allocation4]   ;;  %s3026_s13 = scalar_lea.hbm %s3476_s2, 2048 }
   0x2   :  { %s25_s10 = sshll.u32 %s3074_s30, 4  ;;  %p3027_p0 = scmp.ne.s32.totalorder %s3476_s2, %s3026_s13  ;;  %s26_s10 = int_to_ptr.vmem [resolvable:$true] %s25_s10 }
   0x3   :  { %p3030_p1 = scmp.lt.u32.totalorder %s3026_s13, %s3476_s2 }
   0x5   :  { %p3032_p2 = pnand %p3030_p1, %p3027_p0 }
   0x7   :  { %3035 = shalt.err (!%p3032_p2)
}
   0x8   :  { %s3036_s18 = scalar_lea.vmem %s26_s10, 2048  ;;  %p3041_p4 = scmp.lt.s32.totalorder %s26_s10, %s26_s10 }
   0x9   :  { %p3037_p3 = scmp.ne.s32.totalorder %s26_s10, %s3036_s18  ;;  %p3042_p5 = scmp.lt.s32.totalorder %s3036_s18, %s3036_s18 }
   0xb   :  { %p3043_p6 = por %p3042_p5, %p3041_p4 }
   0xd   :  { %p3044_p7 = pnand %p3043_p6, %p3037_p3 }
   0xf   :  { %3047 = shalt.err (!%p3044_p7)
}
  0x10   :  { %s3075_s19 = smov 128   ;;  %s3076_s20 = smov 8  }
  0x11   :  { %31 = dma.hbm_to_vmem [thread:$0]  %s3476_s2, 2048, %s26_s10, [#allocation5], %s3075_s19, %s3075_s19, %s3076_s20  }
  0x12   :  { %3070 = dma.done.wait [#allocation5], 2048  }
  0x13   :  { %3071 = vsyncadd [#allocation5], 4294965248  ;;  %vm66_vm0 = vcmask 261120   ;;  %v55_v0 = vld [vmem:[%s3477_s3] sm:$0xff]  ;;  %v56_v1 = vld [vmem:[%s3477_s3 + $0x8] sm:$0xff]  ;;  %v3077_v13 = vmov 0.0|0.0  }
  0x14   :  { %v57_v2 = vld [vmem:[%s3477_s3 + $0x10] sm:$0xff]  ;;  %v2814_v3 = vpack.c.bf16 %v56_v1, %v55_v0  ;;  %v58_v4 = vld [vmem:[%s3477_s3 + $0x18] sm:$0xff]  ;;  %v47_v6 = vld [vmem:[%s3474_s0] sm:$0xff]  ;;  %vm3078_vm1 = vmmov 0   ;;  %v3079_v17 = vmov 0.0   ;;  %vm196_vm2 = vcmask 523264  }
  0x15   :  { %v49_v5 = vld [vmem:[%s3474_s0 + $0x10] sm:$0xff]  ;;  %v2818_v7 = vpack.c.bf16 %v58_v4, %v57_v2  ;;  %2599 = vmatprep.mubr.msk.f32.mxu0 %vm66_vm0, %v47_v6  ;;  %v205_v8 = vld [vmem:[%s3478_s4] sm:$0xff]  ;;  %v206_v9 = vld [vmem:[%s3478_s4 + $0x8] sm:$0xff]  ;;  %s3082_s11 = smov 32   ;;  %s3083_s12 = smov 80   ;;  %vm213_vm3 = vcmask 130048  }
  0x16   :  { %2602 = vmatprep.mubr.msk.f32.mxu1 %vm66_vm0, %v49_v5  ;;  %2918 = vmatprep.subr.bf16.mxu1 %v2814_v3  ;;  %v50_v10 = vld [vmem:[%s3474_s0 + $0x18] sm:$0xff]  ;;  %v48_v11 = vld [vmem:[%s3474_s0 + $0x8] sm:$0xff]  ;;  %v3182_v12 = vpack.c.bf16 %v206_v9, %v205_v8  ;;  %v51_v14 = vld [vmem:[%s3474_s0 + $0x20] sm:$0xff]  ;;  %vm743_vm4 = vcmask 261248   ;;  %s3085_s16 = smov 112   ;;  %vm1011_vm5 = vcmask 392448  }
  0x17   :  { %2815 = vmatprep.subr.bf16.mxu0 %v2814_v3  ;;  %2920 = vmatpush3.bf16.msra.mxu1 %v2814_v3  ;;  %v52_v15 = vld [vmem:[%s3474_s0 + $0x28] sm:$0xff]  ;;  %v53_v16 = vld [vmem:[%s3474_s0 + $0x30] sm:$0xff]  ;;  %v54_v18 = vld [vmem:[%s3474_s0 + $0x38] sm:$0xff]  ;;  %s3080_s0 = smov 96   ;;  %s3086_s17 = smov 64   ;;  %vm1275_vm6 = vcmask 523648  }
  0x18   :  { %2817 = vmatpush3.bf16.msra.mxu0 %v2814_v3  ;;  %2919 = vmatprep.subr.bf16.mxu1 %v2818_v7  ;;  %v2459_v19 = vld [vmem:[%s3479_s5] ss:$0 sm:$0xff]  ;;  %s3081_s5 = smov 16   ;;  %v208_v49 = vld [vmem:[%s3480_s6 + $0x8] sm:$0xff]  ;;  %vm1544_vm7 = vcmask 654848   ;;  %vm1812_vm8 = vcmask 786048  }
  0x19   :  { %2819 = vmatprep.subr.bf16.mxu0 %v2818_v7  ;;  %v207_v48 = vld [vmem:[%s3480_s6] sm:$0xff]  ;;  %v210_v55 = vld [vmem:[%s3481_s7 + $0x8] sm:$0xff]  ;;  %vm2080_vm9 = vcmask 917248   ;;  %vm2348_vm10 = vcmask 1048448   ;;  %s3087_s20 = smov [#allocation7]  }
  0x1a   :  { %v3234_v50 = vpack.c.bf16 %v208_v49, %v207_v48  ;;  %v209_v54 = vld [vmem:[%s3481_s7] sm:$0xff]  ;;  %s2450_s21 = sshll.u32 %s3087_s20, 4  ;;  %s2451_s21 = int_to_ptr.vmem [resolvable:$true] %s2450_s21 }
  0x1b   :  { %2921 = vmatpush3.bf16.msra.mxu1 %v2818_v7  ;;  %v3246_v56 = vpack.c.bf16 %v210_v55, %v209_v54  ;;  %v3266_v58 = vld [vmem:[%s3482_s8] sm:$0xff]  ;;  %s3084_s8 = smov 48   ;;  %s3048_s4 = scalar_lea.vmem %s2451_s21, 128 }
  0x1c   :  { %2821 = vmatpush3.bf16.msra.mxu0 %v2818_v7  ;;  %2822 = vmatprep.subr.bf16.mxu1 %v3077_v13  ;;  %p3049_p8 = scmp.ne.s32.totalorder %s2451_s21, %s3048_s4  ;;  %p3053_p9 = scmp.lt.s32.totalorder %s2451_s21, %s2451_s21 }
  0x1d   :  { %2840 = vmatprep.subr.bf16.mxu0 %v3077_v13  ;;  %p3054_p10 = scmp.lt.s32.totalorder %s3048_s4, %s3048_s4 }
  0x1e   :  { %2603 = vmatmul.mubr.msk.f32.vlgmr.msra.gmra.mrb[0].mxu1 %vm66_vm0, %v50_v10 }
  0x1f   :  { %2600 = vmatmul.mubr.msk.f32.vlgmr.msra.gmra.mrb[0].mxu0 %vm66_vm0, %v48_v11  ;;  %2824 = vmatpush3.bf16.msra.mxu1 %v3182_v12  ;;  %p3055_p11 = por %p3054_p10, %p3053_p9 }
  0x20   :  { %2605 = vmatprep.mubr.msk.f32.mxu1 %vm66_vm0, %v51_v14  ;;  %2825 = vmatprep.subr.bf16.mxu1 %v3077_v13 }
  0x21   :  { %2842 = vmatpush3.bf16.msra.mxu0 %v3182_v12  ;;  %2657 = vmatprep.mubr.msk.f32.mxu0 %vm3078_vm1, %v3079_v17  ;;  %p3056_p12 = pnand %p3055_p11, %p3049_p8 }
  0x22   :  { %2843 = vmatprep.subr.bf16.mxu0 %v3077_v13  ;;  %2606 = vmatmul.mubr.msk.f32.gmra.mrb[2].mxu1 %vm66_vm0, %v52_v15 }
  0x23   :  { %2608 = vmatprep.mubr.msk.f32.mxu1 %vm66_vm0, %v53_v16 }
  0x26   :  { %2609 = vmatmul.mubr.msk.f32.gmra.mrb[4].mxu1 %vm66_vm0, %v54_v18 }
  0x27   :  { %2615 = vmatprep.mubr.msk.f32.mxu1 %vm3078_vm1, %v3079_v17 }
  0x2a   :  { %2616 = vmatmul.mubr.f32.vlgmr.msra.gmra.mrb[6].mxu1 %v3079_v17 }
  0x2b   :  { %2622 = vmatprep.mubr.msk.f32.mxu1 %vm3078_vm1, %v3079_v17  ;;  %2827 = vmatpush3.bf16.msra.mxu1 %v3234_v50 }
  0x2c   :  { %2828 = vmatprep.subr.bf16.mxu1 %v3077_v13 }
  0xf1   :  { %v2604_v20 = vpop.f32.mrb[0].mxu1 }
  0xf2   :  { %v2601_v21 = vpop.f32.mrb[0].mxu0  ;;  %v173_v22 = vadd.f32 %v2604_v20, %v2459_v19  ;;  %v167_v24 = vpop.f32.mrb[1].mxu1 }
  0xf3   :  { %v163_v23 = vadd.f32 %v2601_v21, %v2459_v19  ;;  %v157_v25 = vpop.f32.mrb[1].mxu0  ;;  %v168_v26 = vadd.f32 %v2459_v19, %v167_v24 }
  0xf4   :  { %v158_v27 = vadd.f32 %v2459_v19, %v157_v25  ;;  %200 = vst.msk [vmem:[#allocation2 + $0x18] sm:$0xff] %vm196_vm2, %v173_v22 }
  0xf5   :  { %198 = vst.msk [vmem:[#allocation2 + $0x8] sm:$0xff] %vm196_vm2, %v163_v23  ;;  %199 = vst.msk [vmem:[#allocation2 + $0x10] sm:$0xff] %vm196_vm2, %v168_v26  ;;  %v2607_v28 = vpop.f32.mrb[2].mxu1 }
  0xf6   :  { %197 = vst.msk [vmem:[#allocation2] sm:$0xff] %vm196_vm2, %v158_v27  ;;  %v183_v29 = vadd.f32 %v2607_v28, %v2459_v19  ;;  %v177_v30 = vpop.f32.mrb[3].mxu1 }
  0xf7   :  { %v178_v31 = vadd.f32 %v2459_v19, %v177_v30 }
  0xf8   :  { %202 = vst.msk [vmem:[#allocation2 + $0x28] sm:$0xff] %vm196_vm2, %v183_v29 }
  0xf9   :  { %201 = vst.msk [vmem:[#allocation2 + $0x20] sm:$0xff] %vm196_vm2, %v178_v31  ;;  %v2610_v32 = vpop.f32.mrb[4].mxu1 }
  0xfa   :  { %v193_v33 = vadd.f32 %v2610_v32, %v2459_v19  ;;  %v187_v34 = vpop.f32.mrb[5].mxu1 }
  0xfb   :  { %v188_v35 = vadd.f32 %v2459_v19, %v187_v34 }
  0xfc   :  { %204 = vst.msk [vmem:[#allocation2 + $0x38] sm:$0xff] %vm196_vm2, %v193_v33  ;;  %v479_v62 = vld [vmem:[#allocation2 + $0x8] sm:$0xff]  ;;  %v745_v29 = vld [vmem:[#allocation2 + $0x10] sm:$0xff] }
  0xfd   :  { %v212_v36 = vld [vmem:[#allocation2] sm:$0xff]  ;;  %203 = vst.msk [vmem:[#allocation2 + $0x30] sm:$0xff] %vm196_vm2, %v188_v35  ;;  %v283_v37 = vpop.f32.mrb[6].mxu1 }
  0xfe   :  { %v287_v38 = vadd.f32 %v283_v37, %v212_v36  ;;  %v2617_v39 = vpop.f32.mrb[7].mxu1 }
 0x100   :  { %2960 = vtanh.f32 %v287_v38 }
 0x10a   :  { %v2961_v40 = vpop.eup %2960 }
 0x10b   :  { %293 = vrot.lane.b32.xlu0 %v2961_v40, %s3080_s0  ;;  %v289_v41 = vmul.f32 0.5, %v2961_v40 }
 0x10d   :  { %v290_v42 = vadd.f32 0.5, %v289_v41 }
 0x10f   :  { %v291_v45 = vmul.f32 0.0, %v290_v42 }
 0x17d   :  { %v294_v43 = vpop.permute.xlu0 %293 }
 0x17e   :  { %v296_v44 = vmul.f32 %v294_v43, %v290_v42 }
 0x180   :  { %298 = vrot.lane.b32.xlu0 %v296_v44, %s3081_s5 }
 0x1f2   :  { %v299_v46 = vpop.permute.xlu0 %298 }
 0x1f3   :  { %v301_v47 = vadd.f32 %v299_v46, %v291_v45 }
 0x1f5   :  { %2962 = vtanh.f32 %v301_v47 }
 0x1ff   :  { %v2963_v51 = vpop.eup %2962 }
 0x200   :  { %304 = vrot.lane.b32.xlu1 %v2963_v51, %s3082_s11 }
 0x272   :  { %v305_v52 = vpop.permute.xlu1 %304 }
 0x273   :  { %v307_v53 = vmul.f32 %v305_v52, %v290_v42 }
 0x275   :  { %309 = vrot.lane.b32.xlu1 %v307_v53, %s3083_s12 }
 0x2e7   :  { %v310_v57 = vpop.permute.xlu1 %309 }
 0x2e8   :  { %2623 = vmatmul.mubr.msk.f32.vlgmr.msra.gmra.mrb[8].mxu1 %vm213_vm3, %v310_v57 }
 0x2e9   :  { %2830 = vmatpush3.bf16.msra.mxu1 %v3246_v56  ;;  %2629 = vmatprep.mubr.msk.f32.mxu1 %vm3078_vm1, %v3079_v17 }
 0x2ea   :  { %2831 = vmatprep.subr.bf16.mxu1 %v3077_v13 }
 0x2f0   :  { %2630 = vmatmul.mubr.f32.vlgmr.msra.gmra.mrb[8].mxu1 %v3079_v17 }
 0x2f1   :  { %2833 = vmatpush3.bf16.msra.mxu1 %v3182_v12  ;;  %2636 = vmatprep.mubr.msk.f32.mxu1 %vm3078_vm1, %v3079_v17 }
 0x2f2   :  { %2834 = vmatprep.subr.bf16.mxu1 %v3077_v13 }
 0x2f4   :  { %2637 = vmatmul.mubr.msk.f32.vlgmr.msra.gmra.mrb[10].mxu1 %vm213_vm3, %v310_v57 }
 0x2f5   :  { %2836 = vmatpush3.bf16.msra.mxu1 %v3234_v50  ;;  %2643 = vmatprep.mubr.msk.f32.mxu1 %vm3078_vm1, %v3079_v17 }
 0x2f6   :  { %2837 = vmatprep.subr.bf16.mxu1 %v3077_v13 }
 0x3c3   :  { %v449_v59 = vpop.f32.mrb[8].mxu1 }
 0x3c4   :  { %v2922_v60 = vadd.f32 %v449_v59, %v3266_v58  ;;  %v2631_v61 = vpop.f32.mrb[9].mxu1 }
 0x3c6   :  { %2964 = vtanh.f32 %v2922_v60 }
 0x3c7   :  { %v546_v63 = vpop.f32.mrb[10].mxu1 }
 0x3c8   :  { %v550_v0 = vadd.f32 %v546_v63, %v479_v62  ;;  %v2638_v1 = vpop.f32.mrb[11].mxu1  ;;  %v1013_v63 = vld [vmem:[#allocation2 + $0x18] sm:$0xff] }
 0x3ca   :  { %2966 = vtanh.f32 %v550_v0 }
 0x3d0   :  { %v2965_v2 = vpop.eup %2964 }
 0x3d1   :  { %459 = vrot.lane.b32.xlu1 %v2965_v2, %s3080_s0  ;;  %v455_v4 = vmul.f32 0.5, %v2965_v2 }
 0x3d3   :  { %v456_v5 = vadd.f32 0.5, %v455_v4 }
 0x3d4   :  { %v2967_v3 = vpop.eup %2966 }
 0x3d5   :  { %556 = vrot.lane.b32.xlu0 %v2967_v3, %s3080_s0  ;;  %v552_v6 = vmul.f32 0.5, %v2967_v3  ;;  %v457_v14 = vmul.f32 0.0, %v456_v5 }
 0x3d7   :  { %v553_v9 = vadd.f32 0.5, %v552_v6 }
 0x3d9   :  { %v554_v18 = vmul.f32 %v553_v9, %v301_v47 }
 0x443   :  { %v460_v7 = vpop.permute.xlu1 %459 }
 0x444   :  { %v462_v8 = vmul.f32 %v460_v7, %v456_v5 }
 0x446   :  { %464 = vrot.lane.b32.xlu1 %v462_v8, %s3081_s5 }
 0x447   :  { %v557_v10 = vpop.permute.xlu0 %556 }
 0x448   :  { %v559_v11 = vmul.f32 %v557_v10, %v553_v9 }
 0x44a   :  { %561 = vrot.lane.b32.xlu0 %v559_v11, %s3081_s5 }
 0x4b8   :  { %v465_v15 = vpop.permute.xlu1 %464 }
 0x4b9   :  { %v467_v16 = vadd.f32 %v465_v15, %v457_v14 }
 0x4bb   :  { %2968 = vtanh.f32 %v467_v16 }
 0x4bc   :  { %v562_v19 = vpop.permute.xlu0 %561 }
 0x4bd   :  { %v564_v20 = vadd.f32 %v562_v19, %v554_v18 }
 0x4bf   :  { %2970 = vtanh.f32 %v564_v20 }
 0x4c5   :  { %v2969_v21 = vpop.eup %2968 }
 0x4c6   :  { %470 = vrot.lane.b32.xlu1 %v2969_v21, %s3082_s11 }
 0x4c9   :  { %v2971_v22 = vpop.eup %2970 }
 0x4ca   :  { %567 = vrot.lane.b32.xlu0 %v2971_v22, %s3082_s11 }
 0x538   :  { %v471_v23 = vpop.permute.xlu1 %470 }
 0x539   :  { %v473_v24 = vmul.f32 %v471_v23, %v456_v5 }
 0x53b   :  { %475 = vrot.lane.b32.xlu1 %v473_v24, %s3083_s12 }
 0x53c   :  { %v568_v25 = vpop.permute.xlu0 %567 }
 0x53d   :  { %v570_v26 = vmul.f32 %v568_v25, %v553_v9 }
 0x53f   :  { %572 = vrot.lane.b32.xlu0 %v570_v26, %s3083_s12 }
 0x5ad   :  { %v476_v27 = vpop.permute.xlu1 %475 }
 0x5ae   :  { %478 = vst.msk [vmem:[#allocation3] sm:$0xff] %vm213_vm3, %v476_v27 }
 0x5b1   :  { %v573_v28 = vpop.permute.xlu0 %572 }
 0x5b2   :  { %2644 = vmatmul.mubr.msk.f32.vlgmr.msra.gmra.mrb[12].mxu1 %vm213_vm3, %v573_v28  ;;  %2658 = vmatmul.mubr.msk.f32.vlgmr.msra.gmra.mrb[2].mxu0 %vm213_vm3, %v573_v28 }
 0x5b3   :  { %2839 = vmatpush3.bf16.msra.mxu1 %v3246_v56  ;;  %2650 = vmatprep.mubr.msk.f32.mxu1 %vm3078_vm1, %v3079_v17 }
 0x5b4   :  { %2849 = vmatprep.subr.bf16.mxu1 %v3077_v13  ;;  %2845 = vmatpush3.bf16.msra.mxu0 %v3234_v50 }
 0x5b5   :  { %2664 = vmatprep.mubr.msk.f32.mxu0 %vm3078_vm1, %v3079_v17  ;;  %2846 = vmatprep.subr.bf16.mxu0 %v3077_v13 }
 0x5ba   :  { %2651 = vmatmul.mubr.msk.f32.vlgmr.msra.gmra.mrb[12].mxu1 %vm213_vm3, %v476_v27 }
 0x5bb   :  { %2851 = vmatpush3.bf16.msra.mxu1 %v3182_v12  ;;  %2678 = vmatprep.mubr.msk.f32.mxu1 %vm3078_vm1, %v3079_v17 }
 0x5bc   :  { %2852 = vmatprep.subr.bf16.mxu1 %v3077_v13 }
 0x685   :  { %v812_v30 = vpop.f32.mrb[2].mxu0 }
 0x686   :  { %v816_v31 = vadd.f32 %v812_v30, %v745_v29  ;;  %v2659_v32 = vpop.f32.mrb[3].mxu0 }
 0x688   :  { %2972 = vtanh.f32 %v816_v31 }
 0x68d   :  { %v714_v33 = vpop.f32.mrb[12].mxu1 }
 0x68e   :  { %v2923_v34 = vadd.f32 %v714_v33, %v3266_v58  ;;  %v2652_v35 = vpop.f32.mrb[13].mxu1  ;;  %v1277_v33 = vld [vmem:[#allocation2 + $0x20] sm:$0xff] }
 0x690   :  { %2974 = vtanh.f32 %v2923_v34 }
 0x692   :  { %v2973_v36 = vpop.eup %2972 }
 0x693   :  { %822 = vrot.lane.b32.xlu0 %v2973_v36, %s3080_s0  ;;  %v818_v38 = vmul.f32 0.5, %v2973_v36 }
 0x695   :  { %v819_v39 = vadd.f32 0.5, %v818_v38 }
 0x697   :  { %v820_v46 = vmul.f32 %v819_v39, %v564_v20 }
 0x69a   :  { %v2975_v37 = vpop.eup %2974 }
 0x69b   :  { %724 = vrot.lane.b32.xlu1 %v2975_v37, %s3080_s0  ;;  %v720_v42 = vmul.f32 0.5, %v2975_v37 }
 0x69d   :  { %v721_v43 = vadd.f32 0.5, %v720_v42 }
 0x69f   :  { %v722_v49 = vmul.f32 %v721_v43, %v467_v16 }
 0x705   :  { %v823_v40 = vpop.permute.xlu0 %822 }
 0x706   :  { %v825_v41 = vmul.f32 %v823_v40, %v819_v39 }
 0x708   :  { %827 = vrot.lane.b32.xlu0 %v825_v41, %s3081_s5 }
 0x70d   :  { %v725_v44 = vpop.permute.xlu1 %724 }
 0x70e   :  { %v727_v45 = vmul.f32 %v725_v44, %v721_v43 }
 0x710   :  { %729 = vrot.lane.b32.xlu1 %v727_v45, %s3081_s5 }
 0x77a   :  { %v828_v47 = vpop.permute.xlu0 %827 }
 0x77b   :  { %v830_v48 = vadd.f32 %v828_v47, %v820_v46 }
 0x77d   :  { %2976 = vtanh.f32 %v830_v48 }
 0x782   :  { %v730_v51 = vpop.permute.xlu1 %729 }
 0x783   :  { %v732_v52 = vadd.f32 %v730_v51, %v722_v49 }
 0x785   :  { %2978 = vtanh.f32 %v732_v52 }
 0x787   :  { %v2977_v53 = vpop.eup %2976 }
 0x788   :  { %833 = vrot.lane.b32.xlu0 %v2977_v53, %s3082_s11 }
 0x78f   :  { %v2979_v54 = vpop.eup %2978 }
 0x790   :  { %735 = vrot.lane.b32.xlu1 %v2979_v54, %s3082_s11 }
 0x7fa   :  { %v834_v55 = vpop.permute.xlu0 %833 }
 0x7fb   :  { %v836_v57 = vmul.f32 %v834_v55, %v819_v39 }
 0x7fd   :  { %838 = vrot.lane.b32.xlu0 %v836_v57, %s3083_s12 }
 0x802   :  { %v736_v59 = vpop.permute.xlu1 %735 }
 0x803   :  { %v3301_v60 = vmul.f32 %v736_v59, %v721_v43 }
 0x805   :  { %912 = vrot.lane.b32.xlu1 %v3301_v60, %s3083_s12 }
 0x86f   :  { %v839_v61 = vpop.permute.xlu0 %838 }
 0x870   :  { %2665 = vmatmul.mubr.msk.f32.vlgmr.msra.gmra.mrb[4].mxu0 %vm213_vm3, %v839_v61  ;;  %2679 = vmatmul.mubr.msk.f32.vlgmr.msra.gmra.mrb[14].mxu1 %vm213_vm3, %v839_v61 }
 0x871   :  { %2848 = vmatpush3.bf16.msra.mxu0 %v3246_v56  ;;  %2671 = vmatprep.mubr.msk.f32.mxu0 %vm3078_vm1, %v3079_v17 }
 0x872   :  { %2858 = vmatprep.subr.bf16.mxu0 %v3077_v13  ;;  %2854 = vmatpush3.bf16.msra.mxu1 %v3234_v50 }
 0x873   :  { %2685 = vmatprep.mubr.msk.f32.mxu1 %vm3078_vm1, %v3079_v17  ;;  %2855 = vmatprep.subr.bf16.mxu1 %v3077_v13 }
 0x877   :  { %v913_v62 = vpop.permute.xlu1 %912 }
 0x878   :  { %2672 = vmatmul.mubr.msk.f32.vlgmr.msra.gmra.mrb[4].mxu0 %vm213_vm3, %v913_v62 }
 0x879   :  { %2860 = vmatpush3.bf16.msra.mxu0 %v3182_v12  ;;  %2699 = vmatprep.mubr.msk.f32.mxu0 %vm3078_vm1, %v3079_v17 }
 0x87a   :  { %2861 = vmatprep.subr.bf16.mxu0 %v3077_v13 }
 0x943   :  { %v1080_v0 = vpop.f32.mrb[14].mxu1 }
 0x944   :  { %v1084_v1 = vadd.f32 %v1080_v0, %v1013_v63  ;;  %v2680_v2 = vpop.f32.mrb[15].mxu1 }
 0x946   :  { %2980 = vtanh.f32 %v1084_v1 }
 0x94b   :  { %v982_v3 = vpop.f32.mrb[4].mxu0 }
 0x94c   :  { %v2924_v4 = vadd.f32 %v982_v3, %v3266_v58  ;;  %v2673_v5 = vpop.f32.mrb[5].mxu0 }
 0x94e   :  { %2982 = vtanh.f32 %v2924_v4  ;;  %v1546_v4 = vld [vmem:[#allocation2 + $0x28] sm:$0xff] }
 0x950   :  { %v2981_v6 = vpop.eup %2980 }
 0x951   :  { %1090 = vrot.lane.b32.xlu0 %v2981_v6, %s3080_s0  ;;  %v1086_v8 = vmul.f32 0.5, %v2981_v6 }
 0x953   :  { %v1087_v9 = vadd.f32 0.5, %v1086_v8 }
 0x955   :  { %v1088_v19 = vmul.f32 %v1087_v9, %v830_v48 }
 0x958   :  { %v2983_v7 = vpop.eup %2982 }
 0x959   :  { %992 = vrot.lane.b32.xlu1 %v2983_v7, %s3080_s0  ;;  %v988_v14 = vmul.f32 0.5, %v2983_v7 }
 0x95b   :  { %v989_v15 = vadd.f32 0.5, %v988_v14 }
 0x95d   :  { %v990_v22 = vmul.f32 %v989_v15, %v732_v52 }
 0x9c3   :  { %v1091_v10 = vpop.permute.xlu0 %1090 }
 0x9c4   :  { %v1093_v11 = vmul.f32 %v1091_v10, %v1087_v9 }
 0x9c6   :  { %1095 = vrot.lane.b32.xlu0 %v1093_v11, %s3081_s5 }
 0x9cb   :  { %v993_v16 = vpop.permute.xlu1 %992 }
 0x9cc   :  { %v995_v18 = vmul.f32 %v993_v16, %v989_v15 }
 0x9ce   :  { %997 = vrot.lane.b32.xlu1 %v995_v18, %s3081_s5 }
 0xa38   :  { %v1096_v20 = vpop.permute.xlu0 %1095 }
 0xa39   :  { %v1098_v21 = vadd.f32 %v1096_v20, %v1088_v19 }
 0xa3b   :  { %2984 = vtanh.f32 %v1098_v21 }
 0xa40   :  { %v998_v23 = vpop.permute.xlu1 %997 }
 0xa41   :  { %v1000_v24 = vadd.f32 %v998_v23, %v990_v22 }
 0xa43   :  { %2986 = vtanh.f32 %v1000_v24 }
 0xa45   :  { %v2985_v25 = vpop.eup %2984 }
 0xa46   :  { %1101 = vrot.lane.b32.xlu0 %v2985_v25, %s3082_s11 }
 0xa4d   :  { %v2987_v26 = vpop.eup %2986 }
 0xa4e   :  { %1003 = vrot.lane.b32.xlu1 %v2987_v26, %s3082_s11 }
 0xab8   :  { %v1102_v27 = vpop.permute.xlu0 %1101 }
 0xab9   :  { %v1104_v28 = vmul.f32 %v1102_v27, %v1087_v9 }
 0xabb   :  { %1106 = vrot.lane.b32.xlu0 %v1104_v28, %s3083_s12 }
 0xac0   :  { %v1004_v29 = vpop.permute.xlu1 %1003 }
 0xac1   :  { %v3328_v30 = vmul.f32 %v1004_v29, %v989_v15 }
 0xac3   :  { %1180 = vrot.lane.b32.xlu1 %v3328_v30, %s3083_s12 }
 0xb2d   :  { %v1107_v31 = vpop.permute.xlu0 %1106 }
 0xb2e   :  { %2686 = vmatmul.mubr.msk.f32.vlgmr.msra.gmra.mrb[16].mxu1 %vm213_vm3, %v1107_v31  ;;  %2700 = vmatmul.mubr.msk.f32.vlgmr.msra.gmra.mrb[6].mxu0 %vm213_vm3, %v1107_v31 }
 0xb2f   :  { %2857 = vmatpush3.bf16.msra.mxu1 %v3246_v56  ;;  %2692 = vmatprep.mubr.msk.f32.mxu1 %vm3078_vm1, %v3079_v17 }
 0xb30   :  { %2867 = vmatprep.subr.bf16.mxu1 %v3077_v13  ;;  %2863 = vmatpush3.bf16.msra.mxu0 %v3234_v50 }
 0xb31   :  { %2706 = vmatprep.mubr.msk.f32.mxu0 %vm3078_vm1, %v3079_v17  ;;  %2864 = vmatprep.subr.bf16.mxu0 %v3077_v13 }
 0xb35   :  { %v1181_v32 = vpop.permute.xlu1 %1180 }
 0xb36   :  { %2693 = vmatmul.mubr.msk.f32.vlgmr.msra.gmra.mrb[16].mxu1 %vm213_vm3, %v1181_v32 }
 0xb37   :  { %2869 = vmatpush3.bf16.msra.mxu1 %v3182_v12  ;;  %2720 = vmatprep.mubr.msk.f32.mxu1 %vm3078_vm1, %v3079_v17 }
 0xb38   :  { %2870 = vmatprep.subr.bf16.mxu1 %v3077_v13 }
 0xc01   :  { %v1344_v34 = vpop.f32.mrb[6].mxu0 }
 0xc02   :  { %v1348_v35 = vadd.f32 %v1344_v34, %v1277_v33  ;;  %v2701_v36 = vpop.f32.mrb[7].mxu0 }
 0xc04   :  { %2988 = vtanh.f32 %v1348_v35 }
 0xc09   :  { %v1250_v37 = vpop.f32.mrb[16].mxu1 }
 0xc0a   :  { %v2925_v38 = vadd.f32 %v1250_v37, %v3266_v58  ;;  %v2694_v39 = vpop.f32.mrb[17].mxu1 }
 0xc0b   :  { %v1814_v39 = vld [vmem:[#allocation2 + $0x30] sm:$0xff] }
 0xc0c   :  { %2990 = vtanh.f32 %v2925_v38 }
 0xc0e   :  { %v2989_v40 = vpop.eup %2988 }
 0xc0f   :  { %1354 = vrot.lane.b32.xlu0 %v2989_v40, %s3080_s0  ;;  %v1350_v42 = vmul.f32 0.5, %v2989_v40 }
 0xc11   :  { %v1351_v43 = vadd.f32 0.5, %v1350_v42 }
 0xc13   :  { %v1352_v51 = vmul.f32 %v1351_v43, %v1098_v21 }
 0xc16   :  { %v2991_v41 = vpop.eup %2990 }
 0xc17   :  { %1260 = vrot.lane.b32.xlu1 %v2991_v41, %s3080_s0  ;;  %v1256_v46 = vmul.f32 0.5, %v2991_v41 }
 0xc19   :  { %v1257_v47 = vadd.f32 0.5, %v1256_v46 }
 0xc1b   :  { %v1258_v54 = vmul.f32 %v1257_v47, %v1000_v24 }
 0xc81   :  { %v1355_v44 = vpop.permute.xlu0 %1354 }
 0xc82   :  { %v1357_v45 = vmul.f32 %v1355_v44, %v1351_v43 }
 0xc84   :  { %1359 = vrot.lane.b32.xlu0 %v1357_v45, %s3081_s5 }
 0xc89   :  { %v1261_v48 = vpop.permute.xlu1 %1260 }
 0xc8a   :  { %v1263_v49 = vmul.f32 %v1261_v48, %v1257_v47 }
 0xc8c   :  { %1265 = vrot.lane.b32.xlu1 %v1263_v49, %s3081_s5 }
 0xcf6   :  { %v1360_v52 = vpop.permute.xlu0 %1359 }
 0xcf7   :  { %v1362_v53 = vadd.f32 %v1360_v52, %v1352_v51 }
 0xcf9   :  { %2992 = vtanh.f32 %v1362_v53 }
 0xcfe   :  { %v1266_v55 = vpop.permute.xlu1 %1265 }
 0xcff   :  { %v1268_v57 = vadd.f32 %v1266_v55, %v1258_v54 }
 0xd01   :  { %2994 = vtanh.f32 %v1268_v57 }
 0xd03   :  { %v2993_v59 = vpop.eup %2992 }
 0xd04   :  { %1365 = vrot.lane.b32.xlu0 %v2993_v59, %s3082_s11 }
 0xd0b   :  { %v2995_v61 = vpop.eup %2994 }
 0xd0c   :  { %1271 = vrot.lane.b32.xlu1 %v2995_v61, %s3082_s11 }
 0xd76   :  { %v1366_v62 = vpop.permute.xlu0 %1365 }
 0xd77   :  { %v1368_v63 = vmul.f32 %v1366_v62, %v1351_v43 }
 0xd79   :  { %1370 = vrot.lane.b32.xlu0 %v1368_v63, %s3083_s12 }
 0xd7e   :  { %v1272_v0 = vpop.permute.xlu1 %1271 }
 0xd7f   :  { %v3355_v1 = vmul.f32 %v1272_v0, %v1257_v47 }
 0xd81   :  { %1445 = vrot.lane.b32.xlu1 %v3355_v1, %s3083_s12 }
 0xdeb   :  { %v1371_v2 = vpop.permute.xlu0 %1370 }
 0xdec   :  { %2707 = vmatmul.mubr.msk.f32.vlgmr.msra.gmra.mrb[8].mxu0 %vm213_vm3, %v1371_v2  ;;  %2721 = vmatmul.mubr.msk.f32.vlgmr.msra.gmra.mrb[18].mxu1 %vm213_vm3, %v1371_v2 }
 0xded   :  { %2866 = vmatpush3.bf16.msra.mxu0 %v3246_v56  ;;  %2713 = vmatprep.mubr.msk.f32.mxu0 %vm3078_vm1, %v3079_v17 }
 0xdee   :  { %2876 = vmatprep.subr.bf16.mxu0 %v3077_v13  ;;  %2872 = vmatpush3.bf16.msra.mxu1 %v3234_v50 }
 0xdef   :  { %2727 = vmatprep.mubr.msk.f32.mxu1 %vm3078_vm1, %v3079_v17  ;;  %2873 = vmatprep.subr.bf16.mxu1 %v3077_v13 }
 0xdf3   :  { %v1446_v3 = vpop.permute.xlu1 %1445 }
 0xdf4   :  { %2714 = vmatmul.mubr.msk.f32.vlgmr.msra.gmra.mrb[8].mxu0 %vm213_vm3, %v1446_v3 }
 0xdf5   :  { %2878 = vmatpush3.bf16.msra.mxu0 %v3182_v12  ;;  %2741 = vmatprep.mubr.msk.f32.mxu0 %vm3078_vm1, %v3079_v17 }
 0xdf6   :  { %2879 = vmatprep.subr.bf16.mxu0 %v3077_v13 }
 0xebf   :  { %v1613_v5 = vpop.f32.mrb[18].mxu1 }
 0xec0   :  { %v1617_v6 = vadd.f32 %v1613_v5, %v1546_v4  ;;  %v2722_v7 = vpop.f32.mrb[19].mxu1 }
 0xec2   :  { %2996 = vtanh.f32 %v1617_v6 }
 0xec7   :  { %v1515_v8 = vpop.f32.mrb[8].mxu0 }
 0xec8   :  { %v2926_v9 = vadd.f32 %v1515_v8, %v3266_v58  ;;  %v2715_v10 = vpop.f32.mrb[9].mxu0 }
 0xec9   :  { %v2082_v10 = vld [vmem:[#allocation2 + $0x38] sm:$0xff] }
 0xeca   :  { %2998 = vtanh.f32 %v2926_v9 }
 0xecc   :  { %v2997_v11 = vpop.eup %2996 }
 0xecd   :  { %1623 = vrot.lane.b32.xlu0 %v2997_v11, %s3080_s0  ;;  %v1619_v15 = vmul.f32 0.5, %v2997_v11 }
 0xecf   :  { %v1620_v16 = vadd.f32 0.5, %v1619_v15 }
 0xed1   :  { %v1621_v24 = vmul.f32 %v1620_v16, %v1362_v53 }
 0xed4   :  { %v2999_v14 = vpop.eup %2998 }
 0xed5   :  { %1525 = vrot.lane.b32.xlu1 %v2999_v14, %s3080_s0  ;;  %v1521_v20 = vmul.f32 0.5, %v2999_v14 }
 0xed7   :  { %v1522_v21 = vadd.f32 0.5, %v1521_v20 }
 0xed9   :  { %v1523_v27 = vmul.f32 %v1522_v21, %v1268_v57 }
 0xf3f   :  { %v1624_v18 = vpop.permute.xlu0 %1623 }
 0xf40   :  { %v1626_v19 = vmul.f32 %v1624_v18, %v1620_v16 }
 0xf42   :  { %1628 = vrot.lane.b32.xlu0 %v1626_v19, %s3081_s5 }
 0xf47   :  { %v1526_v22 = vpop.permute.xlu1 %1525 }
 0xf48   :  { %v1528_v23 = vmul.f32 %v1526_v22, %v1522_v21 }
 0xf4a   :  { %1530 = vrot.lane.b32.xlu1 %v1528_v23, %s3081_s5 }
 0xfb4   :  { %v1629_v25 = vpop.permute.xlu0 %1628 }
 0xfb5   :  { %v1631_v26 = vadd.f32 %v1629_v25, %v1621_v24 }
 0xfb7   :  { %3000 = vtanh.f32 %v1631_v26 }
 0xfbc   :  { %v1531_v28 = vpop.permute.xlu1 %1530 }
 0xfbd   :  { %v1533_v29 = vadd.f32 %v1531_v28, %v1523_v27 }
 0xfbf   :  { %3002 = vtanh.f32 %v1533_v29 }
 0xfc1   :  { %v3001_v31 = vpop.eup %3000 }
 0xfc2   :  { %1634 = vrot.lane.b32.xlu0 %v3001_v31, %s3082_s11 }
 0xfc9   :  { %v3003_v32 = vpop.eup %3002 }
 0xfca   :  { %1536 = vrot.lane.b32.xlu1 %v3003_v32, %s3082_s11 }
0x1034   :  { %v1635_v33 = vpop.permute.xlu0 %1634 }
0x1035   :  { %v1637_v34 = vmul.f32 %v1635_v33, %v1620_v16 }
0x1037   :  { %1639 = vrot.lane.b32.xlu0 %v1637_v34, %s3083_s12 }
0x103c   :  { %v1537_v35 = vpop.permute.xlu1 %1536 }
0x103d   :  { %v3382_v36 = vmul.f32 %v1537_v35, %v1522_v21 }
0x103f   :  { %1713 = vrot.lane.b32.xlu1 %v3382_v36, %s3083_s12 }
0x10a9   :  { %v1640_v37 = vpop.permute.xlu0 %1639 }
0x10aa   :  { %2728 = vmatmul.mubr.msk.f32.vlgmr.msra.gmra.mrb[20].mxu1 %vm213_vm3, %v1640_v37  ;;  %2742 = vmatmul.mubr.msk.f32.vlgmr.msra.gmra.mrb[10].mxu0 %vm213_vm3, %v1640_v37 }
0x10ab   :  { %2875 = vmatpush3.bf16.msra.mxu1 %v3246_v56  ;;  %2734 = vmatprep.mubr.msk.f32.mxu1 %vm3078_vm1, %v3079_v17 }
0x10ac   :  { %2885 = vmatprep.subr.bf16.mxu1 %v3077_v13  ;;  %2881 = vmatpush3.bf16.msra.mxu0 %v3234_v50 }
0x10ad   :  { %2748 = vmatprep.mubr.msk.f32.mxu0 %vm3078_vm1, %v3079_v17  ;;  %2882 = vmatprep.subr.bf16.mxu0 %v3077_v13 }
0x10b1   :  { %v1714_v38 = vpop.permute.xlu1 %1713 }
0x10b2   :  { %2735 = vmatmul.mubr.msk.f32.vlgmr.msra.gmra.mrb[20].mxu1 %vm213_vm3, %v1714_v38 }
0x10b3   :  { %2887 = vmatpush3.bf16.msra.mxu1 %v3182_v12  ;;  %2762 = vmatprep.mubr.msk.f32.mxu1 %vm3078_vm1, %v3079_v17 }
0x10b4   :  { %2888 = vmatprep.subr.bf16.mxu1 %v3077_v13 }
0x117d   :  { %v1881_v40 = vpop.f32.mrb[10].mxu0 }
0x117e   :  { %v1885_v41 = vadd.f32 %v1881_v40, %v1814_v39  ;;  %v2743_v42 = vpop.f32.mrb[11].mxu0 }
0x1180   :  { %3004 = vtanh.f32 %v1885_v41 }
0x1185   :  { %v1783_v43 = vpop.f32.mrb[20].mxu1 }
0x1186   :  { %v2927_v44 = vadd.f32 %v1783_v43, %v3266_v58  ;;  %v2736_v45 = vpop.f32.mrb[21].mxu1 }
0x1188   :  { %3006 = vtanh.f32 %v2927_v44 }
0x118a   :  { %v3005_v46 = vpop.eup %3004 }
0x118b   :  { %1891 = vrot.lane.b32.xlu0 %v3005_v46, %s3080_s0  ;;  %v1887_v12 = vmul.f32 0.5, %v3005_v46 }
0x118d   :  { %v1888_v48 = vadd.f32 0.5, %v1887_v12 }
0x118f   :  { %v1889_v57 = vmul.f32 %v1888_v48, %v1631_v26 }
0x1192   :  { %v3007_v47 = vpop.eup %3006 }
0x1193   :  { %1793 = vrot.lane.b32.xlu1 %v3007_v47, %s3080_s0  ;;  %v1789_v52 = vmul.f32 0.5, %v3007_v47 }
0x1195   :  { %v1790_v53 = vadd.f32 0.5, %v1789_v52 }
0x1197   :  { %v1791_v62 = vmul.f32 %v1790_v53, %v1533_v29 }
0x11fd   :  { %v1892_v49 = vpop.permute.xlu0 %1891 }
0x11fe   :  { %v1894_v51 = vmul.f32 %v1892_v49, %v1888_v48 }
0x1200   :  { %1896 = vrot.lane.b32.xlu0 %v1894_v51, %s3081_s5 }
0x1205   :  { %v1794_v54 = vpop.permute.xlu1 %1793 }
0x1206   :  { %v1796_v55 = vmul.f32 %v1794_v54, %v1790_v53  ;;  %v2354_v54 = vld [vmem:[#allocation4] sm:$0xff] }
0x1208   :  { %1798 = vrot.lane.b32.xlu1 %v1796_v55, %s3081_s5  ;;  %v2355_v55 = vld [vmem:[#allocation4 + $0x8] sm:$0xff] }
0x1272   :  { %v1897_v59 = vpop.permute.xlu0 %1896 }
0x1273   :  { %v1899_v61 = vadd.f32 %v1897_v59, %v1889_v57  ;;  %v2356_v57 = vld [vmem:[#allocation4 + $0x10] sm:$0xff]  ;;  %v2895_v59 = vpack.c.bf16 %v2355_v55, %v2354_v54 }
0x1275   :  { %3008 = vtanh.f32 %v1899_v61 }
0x127a   :  { %v1799_v63 = vpop.permute.xlu1 %1798 }
0x127b   :  { %v1801_v0 = vadd.f32 %v1799_v63, %v1791_v62  ;;  %v2359_v63 = vld [vmem:[#allocation4 + $0x28] sm:$0xff] }
0x127d   :  { %3010 = vtanh.f32 %v1801_v0 }
0x127f   :  { %v3009_v2 = vpop.eup %3008 }
0x1280   :  { %1902 = vrot.lane.b32.xlu0 %v3009_v2, %s3082_s11  ;;  %v2360_v2 = vld [vmem:[#allocation4 + $0x30] sm:$0xff] }
0x1287   :  { %v3011_v3 = vpop.eup %3010 }
0x1288   :  { %1804 = vrot.lane.b32.xlu1 %v3011_v3, %s3082_s11  ;;  %v2361_v3 = vld [vmem:[#allocation4 + $0x38] sm:$0xff] }
0x12f2   :  { %v1903_v4 = vpop.permute.xlu0 %1902 }
0x12f3   :  { %v1905_v5 = vmul.f32 %v1903_v4, %v1888_v48  ;;  %v2904_v4 = vpack.c.bf16 %v2361_v3, %v2360_v2 }
0x12f5   :  { %1907 = vrot.lane.b32.xlu0 %v1905_v5, %s3083_s12  ;;  %v2362_v5 = vld [vmem:[#allocation4 + $0x40] sm:$0xff] }
0x12fa   :  { %v1805_v6 = vpop.permute.xlu1 %1804 }
0x12fb   :  { %v3409_v7 = vmul.f32 %v1805_v6, %v1790_v53  ;;  %v2363_v6 = vld [vmem:[#allocation4 + $0x48] sm:$0xff] }
0x12fd   :  { %1981 = vrot.lane.b32.xlu1 %v3409_v7, %s3083_s12 }
0x1367   :  { %v1908_v8 = vpop.permute.xlu0 %1907 }
0x1368   :  { %2749 = vmatmul.mubr.msk.f32.vlgmr.msra.gmra.mrb[12].mxu0 %vm213_vm3, %v1908_v8  ;;  %2763 = vmatmul.mubr.msk.f32.vlgmr.msra.gmra.mrb[22].mxu1 %vm213_vm3, %v1908_v8  ;;  %v2907_v8 = vpack.c.bf16 %v2363_v6, %v2362_v5 }
0x1369   :  { %2884 = vmatpush3.bf16.msra.mxu0 %v3246_v56  ;;  %2755 = vmatprep.mubr.msk.f32.mxu0 %vm3078_vm1, %v3079_v17 }
0x136a   :  { %2890 = vmatpush3.bf16.msra.mxu1 %v3234_v50  ;;  %2769 = vmatprep.mubr.msk.f32.mxu1 %vm3078_vm1, %v3079_v17 }
0x136b   :  { %2891 = vmatprep.subr.bf16.mxu1 %v3077_v13  ;;  %2894 = vmatprep.subr.bf16.mxu0 %v3077_v13 }
0x136f   :  { %v1982_v9 = vpop.permute.xlu1 %1981 }
0x1370   :  { %2756 = vmatmul.mubr.msk.f32.vlgmr.msra.gmra.mrb[12].mxu0 %vm213_vm3, %v1982_v9  ;;  %v2364_v9 = vld [vmem:[#allocation4 + $0x50] sm:$0xff] }
0x1371   :  { %2811 = vmatprep.mubr.msk.f32.mxu0 %vm3078_vm1, %v3079_v17  ;;  %2896 = vmatpush3.bf16.msra.mxu0 %v2895_v59 }
0x1372   :  { %2897 = vmatprep.subr.bf16.mxu0 %v3077_v13 }
0x143b   :  { %v2149_v11 = vpop.f32.mrb[22].mxu1 }
0x143c   :  { %v2153_v14 = vadd.f32 %v2149_v11, %v2082_v10  ;;  %v2764_v15 = vpop.f32.mrb[23].mxu1  ;;  %v2365_v10 = vld [vmem:[#allocation4 + $0x58] sm:$0xff] }
0x143d   :  { %v2910_v11 = vpack.c.bf16 %v2365_v10, %v2364_v9 }
0x143e   :  { %3012 = vtanh.f32 %v2153_v14  ;;  %v2367_v14 = vld [vmem:[#allocation4 + $0x68] sm:$0xff] }
0x1443   :  { %v2051_v16 = vpop.f32.mrb[12].mxu0 }
0x1444   :  { %v2928_v50 = vadd.f32 %v2051_v16, %v3266_v58  ;;  %v2757_v18 = vpop.f32.mrb[13].mxu0  ;;  %v2368_v16 = vld [vmem:[#allocation4 + $0x70] sm:$0xff] }
0x1446   :  { %3014 = vtanh.f32 %v2928_v50  ;;  %v2369_v50 = vld [vmem:[#allocation4 + $0x78] sm:$0xff] }
0x1448   :  { %v3013_v19 = vpop.eup %3012 }
0x1449   :  { %2159 = vrot.lane.b32.xlu0 %v3013_v19, %s3080_s0  ;;  %v2155_v21 = vmul.f32 0.5, %v3013_v19 }
0x144b   :  { %v2156_v22 = vadd.f32 0.5, %v2155_v21 }
0x144d   :  { %v2157_v29 = vmul.f32 %v2156_v22, %v1899_v61  ;;  %v2357_v61 = vld [vmem:[#allocation4 + $0x18] sm:$0xff] }
0x144e   :  { %v2898_v62 = vpack.c.bf16 %v2357_v61, %v2356_v57 }
0x1450   :  { %v3015_v20 = vpop.eup %3014  ;;  %2899 = vmatpush3.bf16.msra.mxu0 %v2898_v62 }
0x1451   :  { %2061 = vrot.lane.b32.xlu1 %v3015_v20, %s3080_s0  ;;  %v2057_v25 = vmul.f32 0.5, %v3015_v20  ;;  %2900 = vmatprep.subr.bf16.mxu0 %v3077_v13 }
0x1453   :  { %v2058_v26 = vadd.f32 0.5, %v2057_v25 }
0x1455   :  { %v2059_v33 = vmul.f32 %v2058_v26, %v1801_v0 }
0x14bb   :  { %v2160_v23 = vpop.permute.xlu0 %2159 }
0x14bc   :  { %v2162_v24 = vmul.f32 %v2160_v23, %v2156_v22 }
0x14be   :  { %2164 = vrot.lane.b32.xlu0 %v2162_v24, %s3081_s5  ;;  %v2351_v24 = vld [vmem:[%s3475_s1] sm:$0xff] }
0x14c3   :  { %v2062_v27 = vpop.permute.xlu1 %2061 }
0x14c4   :  { %v2064_v28 = vmul.f32 %v2062_v27, %v2058_v26 }
0x14c6   :  { %2066 = vrot.lane.b32.xlu1 %v2064_v28, %s3081_s5 }
0x1530   :  { %v2165_v31 = vpop.permute.xlu0 %2164 }
0x1531   :  { %v2167_v32 = vadd.f32 %v2165_v31, %v2157_v29 }
0x1533   :  { %3016 = vtanh.f32 %v2167_v32 }
0x1538   :  { %v2067_v34 = vpop.permute.xlu1 %2066 }
0x1539   :  { %v2069_v35 = vadd.f32 %v2067_v34, %v2059_v33 }
0x153b   :  { %3018 = vtanh.f32 %v2069_v35 }
0x153d   :  { %v3017_v37 = vpop.eup %3016 }
0x153e   :  { %2170 = vrot.lane.b32.xlu0 %v3017_v37, %s3082_s11 }
0x1545   :  { %v3019_v38 = vpop.eup %3018 }
0x1546   :  { %2072 = vrot.lane.b32.xlu1 %v3019_v38, %s3082_s11 }
0x15b0   :  { %v2171_v39 = vpop.permute.xlu0 %2170 }
0x15b1   :  { %v2173_v40 = vmul.f32 %v2171_v39, %v2156_v22 }
0x15b3   :  { %2175 = vrot.lane.b32.xlu0 %v2173_v40, %s3083_s12 }
0x15b8   :  { %v2073_v41 = vpop.permute.xlu1 %2072 }
0x15b9   :  { %v2075_v42 = vmul.f32 %v2073_v41, %v2058_v26 }
0x15bb   :  { %2249 = vrot.lane.b32.xlu1 %v2075_v42, %s3083_s12 }
0x1625   :  { %v2176_v43 = vpop.permute.xlu0 %2175 }
0x1626   :  { %2770 = vmatmul.mubr.msk.f32.vlgmr.msra.gmra.mrb[24].mxu1 %vm213_vm3, %v2176_v43 }
0x1627   :  { %2893 = vmatpush3.bf16.msra.mxu1 %v3246_v56  ;;  %2776 = vmatprep.mubr.msk.f32.mxu1 %vm3078_vm1, %v3079_v17 }
0x162d   :  { %v2250_v44 = vpop.permute.xlu1 %2249 }
0x162e   :  { %2777 = vmatmul.mubr.msk.f32.vlgmr.msra.gmra.mrb[24].mxu1 %vm213_vm3, %v2250_v44 }
0x1701   :  { %v2319_v45 = vpop.f32.mrb[24].mxu1 }
0x1702   :  { %v2929_v46 = vadd.f32 %v2319_v45, %v3266_v58  ;;  %v2778_v47 = vpop.f32.mrb[25].mxu1 }
0x1704   :  { %3020 = vtanh.f32 %v2929_v46 }
0x170e   :  { %v3021_v12 = vpop.eup %3020 }
0x170f   :  { %2329 = vrot.lane.b32.xlu0 %v3021_v12, %s3080_s0  ;;  %v2325_v48 = vmul.f32 0.5, %v3021_v12 }
0x1711   :  { %v2326_v49 = vadd.f32 0.5, %v2325_v48 }
0x1713   :  { %v2327_v17 = vmul.f32 %v2326_v49, %v2069_v35 }
0x1781   :  { %v2330_v51 = vpop.permute.xlu0 %2329 }
0x1782   :  { %v2332_v52 = vmul.f32 %v2330_v51, %v2326_v49 }
0x1784   :  { %2334 = vrot.lane.b32.xlu1 %v2332_v52, %s3081_s5 }
0x1788   :  { %740 = vrot.lane.b32.xlu1 %v3301_v60, %s3080_s0 }
0x178c   :  { %1541 = vrot.lane.b32.xlu1 %v3382_v36, %s3081_s5  ;;  %v2358_v36 = vld [vmem:[#allocation4 + $0x20] sm:$0xff] }
0x178d   :  { %v2901_v0 = vpack.c.bf16 %v2359_v63, %v2358_v36 }
0x178f   :  { %2902 = vmatpush3.bf16.msra.mxu0 %v2901_v0 }
0x1790   :  { %2077 = vrot.lane.b32.xlu1 %v2075_v42, %s3084_s8  ;;  %2903 = vmatprep.subr.bf16.mxu0 %v3077_v13 }
0x1793   :  { %2905 = vmatpush3.bf16.msra.mxu0 %v2904_v4 }
0x1794   :  { %2906 = vmatprep.subr.bf16.mxu0 %v3077_v13 }
0x1797   :  { %2908 = vmatpush3.bf16.msra.mxu0 %v2907_v8 }
0x1798   :  { %2909 = vmatprep.subr.bf16.mxu0 %v3077_v13 }
0x179b   :  { %2911 = vmatpush3.bf16.msra.mxu0 %v2910_v11 }
0x179c   :  { %2912 = vmatprep.subr.bf16.mxu0 %v3077_v13 }
0x17f6   :  { %v2335_v56 = vpop.permute.xlu1 %2334 }
0x17f7   :  { %v2337_v58 = vadd.f32 %v2335_v56, %v2327_v17 }
0x17f9   :  { %3022 = vtanh.f32 %v2337_v58 }
0x17fa   :  { %v741_v53 = vpop.permute.xlu1 %740 }
0x17fb   :  { %744 = vst.msk [vmem:[#allocation3] sm:$0xff] %vm743_vm4, %v741_v53 }
0x17fe   :  { %v1542_v20 = vpop.permute.xlu1 %1541 }
0x1802   :  { %v2078_v23 = vpop.permute.xlu1 %2077 }
0x1803   :  { %v3023_v60 = vpop.eup %3022 }
0x1804   :  { %2340 = vrot.lane.b32.xlu0 %v3023_v60, %s3082_s11 }
0x1808   :  { %1008 = vrot.lane.b32.xlu0 %v3328_v30, %s3085_s16  ;;  %v2366_v30 = vld [vmem:[#allocation4 + $0x60] sm:$0xff] }
0x1809   :  { %v2913_v15 = vpack.c.bf16 %v2367_v14, %v2366_v30 }
0x180b   :  { %2914 = vmatpush3.bf16.msra.mxu0 %v2913_v15 }
0x180c   :  { %1809 = vrot.lane.b32.xlu0 %v3409_v7, %s3082_s11  ;;  %v2916_v7 = vpack.c.bf16 %v2369_v50, %v2368_v16  ;;  %2915 = vmatprep.subr.bf16.mxu0 %v3077_v13 }
0x180f   :  { %2917 = vmatpush3.bf16.msra.mxu0 %v2916_v7 }
0x1876   :  { %v2341_v18 = vpop.permute.xlu0 %2340 }
0x1877   :  { %v2343_v19 = vmul.f32 %v2341_v18, %v2326_v49 }
0x1879   :  { %2345 = vrot.lane.b32.xlu0 %v2343_v19, %s3086_s17 }
0x187a   :  { %v1009_v21 = vpop.permute.xlu0 %1008 }
0x187b   :  { %1012 = vst.msk [vmem:[#allocation3] sm:$0xff] %vm1011_vm5, %v1009_v21 }
0x187c   :  { %1276 = vst.msk [vmem:[#allocation3] sm:$0xff] %vm1275_vm6, %v3355_v1 }
0x187d   :  { %1545 = vst.msk [vmem:[#allocation3] sm:$0xff] %vm1544_vm7, %v1542_v20 }
0x187e   :  { %v1810_v22 = vpop.permute.xlu0 %1809 }
0x187f   :  { %1813 = vst.msk [vmem:[#allocation3] sm:$0xff] %vm1812_vm8, %v1810_v22 }
0x1880   :  { %2081 = vst.msk [vmem:[#allocation3] sm:$0xff] %vm2080_vm9, %v2078_v23 }
0x18eb   :  { %v2346_v13 = vpop.permute.xlu0 %2345 }
0x18ec   :  { %2349 = vst.msk [vmem:[#allocation3] sm:$0xff] %vm2348_vm10, %v2346_v13 }
0x18f3   :  { %v2350_v25 = vld [vmem:[#allocation3] sm:$0xff] }
0x18f4   :  { %v2352_v26 = vmul.f32 %v2351_v24, %v2350_v25 }
0x18f6   :  { %v2353_v27 = vmul.f32 %v2352_v26, %v2352_v26 }
0x18f8   :  { %2812 = vmatmul.mubr.f32.vlgmr.msra.gmra.mrb[14].mxu0 %v2353_v27 }
0x19cb   :  { %v2436_v28 = vpop.f32.mrb[14].mxu0 }
0x19cc   :  { %v2440_v1 = vmax.f32 %v2436_v28, 1e-24  ;;  %v2813_v29 = vpop.f32.mrb[15].mxu0 }
0x19ce   :  { %3024 = vrsqrt.f32 %v2440_v1 }
0x19d8   :  { %v3025_v31 = vpop.eup %3024 }
0x19d9   :  { %v2442_v32 = vmul.f32 %v3025_v31, %v2352_v26 }
0x19db   :  { %2443 = vst [vmem:[#allocation7] sm:$0xff] %v2442_v32 }
0x19dc   :  { %3059 = shalt.err (!%p3056_p12)
}
0x19dd   :  { %s3060_s23 = scalar_lea.hbm %s3483_s9, 128 }
0x19de   :  { %p3061_p13 = scmp.ne.s32.totalorder %s3483_s9, %s3060_s23  ;;  %p3064_p0 = scmp.lt.u32.totalorder %s3060_s23, %s3483_s9 }
0x19e0   :  { %p3066_p1 = pnand %p3064_p0, %p3061_p13 }
0x19e2   :  { %3069 = shalt.err (!%p3066_p1)
}
0x19e3   :  { %2453 = dma.vmem_to_hbm [thread:$0]  %s2451_s21, 128, %s3483_s9, [#allocation6]  }
0x19e4   :  { %3072 = dma.done.wait [#allocation6], 128  }
0x19e5   :  { %3073 = vsyncadd [#allocation6], 4294967168 }
0x19e6   :  { %2457 = vsyncpa [#allocation5], 1 }
0x19e7   :  { %2458 = vsyncpa [#allocation6], 1 }

</bundles_post_ra>
